<compile_context>
chip_gen: v6e
topology: v6e:2x2x1
jax: 0.10.0
libtpu: 0.0.40
codegen_flags: <defaults>
</compile_context>

<pallas_src>
import functools

import jax
import jax.numpy as jnp
from jax.experimental import pallas as pl
from jax.experimental.pallas import tpu as pltpu


def _round_up(n, m):
    return ((n + m - 1) // m) * m


def _gelu_exact(x):
    # PyTorch nn.GELU() default (erf-based, not the tanh approximation).
    return 0.5 * x * (1.0 + jax.lax.erf(x * jnp.float32(0.7071067811865476)))


def seq_decoder_kernel(x_ref, w_ref, b_ref, wf_ref, bf_ref, o_ref, h_ref, *,
                       depth, ksize, seq_len, fuse_taps, gelu_approximate):
    """One grid step = (one row tile) x (one logit-lane tile).

    x_ref : (R, C)           input rows (R = whole sequences stacked on sublanes), f32
    w_ref : (depth, K*C, C)  fused per-layer conv weights (tap-major rows), compute dtype
    b_ref : (depth, 1, C)    per-layer conv biases, f32
    wf_ref: (C, NT)          1x1 to_logits weight tile (lane-padded), compute dtype
    bf_ref: (1, NT)          to_logits bias tile, f32
    o_ref : (R, NT)          logits tile (lane-dense)
    h_ref : (R, C) scratch   conv-stack output for this row tile (compute dtype),
                             persistent across the inner NT axis.
    """
    nt = pl.program_id(1)
    cdt = h_ref.dtype          # MXU-operand / resident-activation dtype
    pad = ksize // 2

    @pl.when(nt == 0)
    def _conv_stack():
        act = x_ref[...].astype(jnp.float32)                       # (R, C)
        R, C = act.shape

        # Per-tap sequence-boundary masks.  Row tiles hold whole sequences, so the local
        # row index mod seq_len is the within-sequence position.  Hoisted out of the
        # depth loop (JAX does not CSE broadcast_in_dim).
        pos = jax.lax.broadcasted_iota(jnp.int32, (R, 1), 0) % seq_len
        tap_mask = []
        for k in range(ksize):
            off = k - pad
            if off == 0:
                tap_mask.append(None)
            else:
                src = pos + off
                tap_mask.append(jnp.logical_and(src >= 0, src < seq_len))

        for d in range(depth):                                      # depth: small, static
            wd = w_ref[d]                                           # (K*C, C), compute dtype
            # Shifted taps via XLU roll (free slot next to MXU/VPU work) + boundary mask,
            # instead of zero-pad + sublane-concat copies.  Rolls / masks stay f32
            # (v5e's VPU has no bf16; also avoids packed-sublane rotates).
            taps = []
            for k in range(ksize):
                off = k - pad
                if off == 0:
                    taps.append(act)
                else:
                    rolled = pltpu.roll(act, shift=(-off) % R, axis=0)  # rolled[r] = act[r+off]
                    taps.append(jnp.where(tap_mask[k], rolled, 0.0))
            if fuse_taps:
                # Small C: one (R, K*C) @ (K*C, C) push fills the MXU contraction.
                xk = jnp.concatenate(taps, axis=-1).astype(cdt)
                acc = jnp.dot(xk, wd, preferred_element_type=jnp.float32)
            else:
                # MXU-width C: K accumulating pushes, no (R, K*C) concat buffer.
                acc = jnp.dot(taps[0].astype(cdt), wd[0:C, :],
                              preferred_element_type=jnp.float32)
                for k in range(1, ksize):
                    acc = acc + jnp.dot(taps[k].astype(cdt), wd[k * C:(k + 1) * C, :],
                                        preferred_element_type=jnp.float32)
            y = acc + b_ref[d].astype(jnp.float32)                  # bias once, f32
            if gelu_approximate:
                y = jax.nn.gelu(y, approximate=True)                # EUP tanh path (optional)
            else:
                y = _gelu_exact(y)                                  # matches PyTorch nn.GELU()
            act = y
        h_ref[...] = act.astype(cdt)

    # Logits for this (row tile, NT tile): pipelined against the wf-tile DMA and the
    # previous tile's output writeback.
    logits = jnp.dot(h_ref[...], wf_ref[...], preferred_element_type=jnp.float32)
    logits = logits + bf_ref[...].astype(jnp.float32)
    o_ref[...] = logits.astype(o_ref.dtype)


def prepare_params(conv_w, conv_b, logit_w, logit_b, *, compute_dtype=jnp.float32):
    """One-time parameter prep (lane padding, tap flattening, optional bf16 cast).

    conv_w : (depth, K, C_in, C_out)   PyTorch Conv1d weight (C_out, C_in, K) pre-transposed
    conv_b : (depth, C_out) or (depth, 1, C_out)
    logit_w: (dim, num_tokens)         PyTorch 1x1 Conv1d weight (num_tokens, dim, 1) transposed
    logit_b: (num_tokens,) or (1, num_tokens)
    """
    depth, ksize, c_in, c_out = conv_w.shape
    assert c_in == c_out, "SequenceDecoder uses square Conv1d(dim, dim) layers"
    dim = c_in
    num_tokens = logit_w.shape[-1]
    ntp = _round_up(num_tokens, 128)                 # lane-dense padded logits width

    w_flat = conv_w.reshape(depth, ksize * dim, dim).astype(compute_dtype)
    b = conv_b.reshape(depth, 1, dim).astype(jnp.float32)
    wf = (jnp.zeros((dim, ntp), compute_dtype)
          .at[:, :num_tokens].set(logit_w.astype(compute_dtype)))
    bf = (jnp.zeros((1, ntp), jnp.float32)
          .at[:, :num_tokens].set(logit_b.reshape(1, num_tokens).astype(jnp.float32)))
    return dict(w=w_flat, b=b, wf=wf, bf=bf, dim=dim, depth=depth, ksize=ksize,
                num_tokens=num_tokens, ntp=ntp)


def sequence_decoder(x, params, *, max_rows_per_tile=512, max_nt_tile=512,
                     fuse_taps=None, gelu_approximate=False, out_dtype=jnp.float32):
    """x: (B, L, dim) f32 -> (B, L, num_tokens) logits.

    (PyTorch layout is (B, dim, L) -> (B, num_tokens, L); transpose outside if needed --
    the conv / GELU / 1x1 math is identical.)
    """
    B, L, dim = x.shape
    assert dim == params["dim"]
    depth, ksize = params["depth"], params["ksize"]
    num_tokens, ntp = params["num_tokens"], params["ntp"]
    compute_dtype = params["w"].dtype
    N = B * L

    # ---- Row tiling: whole sequences per tile (boundary masks stay exact under tiling),
    # sublane-aligned unless the tile is the full row axis.
    # TODO(synk): for very long sequences (L alone exceeding a sensible row tile), tile
    # inside a sequence and deliver halo rows via the index_map instead.
    target = max(1, min(B, max_rows_per_tile // max(L, 1)))
    seqs_per_tile = B
    for s in range(target, 0, -1):
        if B % s == 0 and ((s * L) % 8 == 0 or s == B):
            seqs_per_tile = s
            break
    row_tile = seqs_per_tile * L
    num_row_tiles = N // row_tile

    # ---- Logit-lane tiling (multiples of 128 keep the padded slab lane-dense).
    nt_tile = min(ntp, _round_up(max(max_nt_tile, 128), 128))
    while ntp % nt_tile != 0:
        nt_tile -= 128
    num_nt_tiles = ntp // nt_tile

    if fuse_taps is None:
        # Fuse the K taps into one contraction only while K*C under-fills the MXU
        # contraction width (256 on v6e/v7x); at MXU-width C use K accumulating pushes.
        fuse_taps = dim < 256

    # ---- Explicit VMEM budget (cap at v7x's 64 MiB physical VMEM so the same tiling runs
    # on v5e/v6e/v7x; v5e's default scoped limit is only 16 MiB).
    cd_bytes = jnp.dtype(compute_dtype).itemsize
    out_bytes = jnp.dtype(out_dtype).itemsize
    vmem_bytes = (
        2 * row_tile * dim * 4                            # x tile (double-buffered, f32)
        + depth * ksize * dim * dim * cd_bytes            # conv weights (single-buffered)
        + depth * dim * 4                                 # conv biases
        + 2 * dim * nt_tile * cd_bytes                    # logits weight tile (double-buffered)
        + 2 * nt_tile * 4                                 # logits bias tile
        + 2 * row_tile * nt_tile * out_bytes              # output tile (double-buffered)
        + row_tile * dim * cd_bytes                       # conv-stack scratch
        + row_tile * (ksize + 3) * dim * 4                # in-kernel temporaries headroom
    )
    vmem_limit = int(min(64 * 1024 * 1024, max(32 * 1024 * 1024, 2 * vmem_bytes)))

    kernel = functools.partial(
        seq_decoder_kernel, depth=depth, ksize=ksize, seq_len=L,
        fuse_taps=fuse_taps, gelu_approximate=gelu_approximate)
    x_flat = x.reshape(N, dim)

    def _run(single_buffer_weights):
        # Grid-constant conv weights/biases: single-buffer them (halves their resident
        # VMEM); the per-NT logits weight/bias tiles keep default double buffering.
        const_kwargs = (dict(pipeline_mode=pl.Buffered(1))
                        if single_buffer_weights else {})
        in_specs = [
            pl.BlockSpec((row_tile, dim), lambda r, nt: (r, 0)),
            pl.BlockSpec((depth, ksize * dim, dim), lambda r, nt: (0, 0, 0), **const_kwargs),
            pl.BlockSpec((depth, 1, dim), lambda r, nt: (0, 0, 0), **const_kwargs),
            pl.BlockSpec((dim, nt_tile), lambda r, nt: (0, nt)),
            pl.BlockSpec((1, nt_tile), lambda r, nt: (0, nt)),
        ]
        return pl.pallas_call(
            kernel,
            out_shape=jax.ShapeDtypeStruct((N, ntp), out_dtype),
            grid_spec=pltpu.PrefetchScalarGridSpec(
                num_scalar_prefetch=0,
                grid=(num_row_tiles, num_nt_tiles),
                in_specs=in_specs,
                out_specs=pl.BlockSpec((row_tile, nt_tile), lambda r, nt: (r, nt)),
                scratch_shapes=[pltpu.VMEM((row_tile, dim), compute_dtype)],
            ),
            compiler_params=pltpu.CompilerParams(
                dimension_semantics=("parallel", "arbitrary"),   # rows across v7x's 2 cores
                vmem_limit_bytes=vmem_limit,
            ),
        )(x_flat, params["w"], params["b"], params["wf"], params["bf"])

    try:
        out = _run(single_buffer_weights=True)
    except Exception:
        # Graceful fallback if this jax build rejects pipeline_mode=pl.Buffered(1) on the
        # grid-constant weight blocks; default double buffering only costs a little extra
        # VMEM for the (small) resident conv weights.
        out = _run(single_buffer_weights=False)

    return out[:, :num_tokens].reshape(B, L, num_tokens)


def ref_forward(x, conv_w, conv_b, logit_w, logit_b, *, depth, ksize):
    """Pure-JAX NLC reference matching the PyTorch module semantics."""
    pad = ksize // 2
    L = x.shape[1]
    for d in range(depth):
        xp = jnp.pad(x, ((0, 0), (pad, pad), (0, 0)))
        y = conv_b[d][None]                                  # (1, 1, C)
        for k in range(ksize):
            y = y + jnp.einsum("blc,cd->bld", xp[:, k:k + L, :], conv_w[d, k])
        x = jax.nn.gelu(y, approximate=False)
    return jnp.einsum("blc,cn->bln", x, logit_w) + logit_b[None]


if __name__ == "__main__":
    # Small shapes consistent with the module:
    # SequenceDecoder(dim=32, depth=2, num_tokens=300, max_seq_len=16, kernel_size=3), batch 2.
    dim, depth, num_tokens, max_seq_len, ksize = 32, 2, 300, 16, 3
    B, L = 2, max_seq_len

    key = jax.random.PRNGKey(0)
    k_x, k_w, k_b, k_wf, k_bf = jax.random.split(key, 5)

    # PyTorch Conv1d weight is (C_out, C_in, K); stored here pre-transposed to
    # (depth, K, C_in, C_out).  to_logits weight (num_tokens, dim, 1) -> (dim, num_tokens).
    x = jax.random.normal(k_x, (B, L, dim), jnp.float32)
    conv_w = 0.1 * jax.random.normal(k_w, (depth, ksize, dim, dim), jnp.float32)
    conv_b = 0.1 * jax.random.normal(k_b, (depth, 1, dim), jnp.float32)
    logit_w = 0.1 * jax.random.normal(k_wf, (dim, num_tokens), jnp.float32)
    logit_b = 0.1 * jax.random.normal(k_bf, (1, num_tokens), jnp.float32)

    ref = ref_forward(x, conv_w, conv_b, logit_w, logit_b, depth=depth, ksize=ksize)

    # f32 path (bit-matches the erf GELU reference).
    params = prepare_params(conv_w, conv_b, logit_w, logit_b)
    out = jax.block_until_ready(sequence_decoder(x, params))
    assert out.shape == (B, L, num_tokens)
    assert jnp.allclose(out, ref, atol=1e-4, rtol=1e-4), "f32 mismatch vs reference"

    # Multi-tile grid (2 row tiles x 3 NT tiles) + per-tap matmul path: exercises the
    # pl.when-guarded conv stack, the persistent VMEM scratch across the inner NT axis,
    # and the non-fused tap accumulation.
    out_tiled = jax.block_until_ready(
        sequence_decoder(x, params, max_rows_per_tile=L, max_nt_tile=128, fuse_taps=False))
    assert jnp.allclose(out_tiled, ref, atol=1e-4, rtol=1e-4), "tiled mismatch vs reference"

    # bf16 MXU-operand path (weights stored in bf16, f32 accumulation) -- looser tolerance.
    params_bf16 = prepare_params(conv_w, conv_b, logit_w, logit_b, compute_dtype=jnp.bfloat16)
    out_bf16 = jax.block_until_ready(sequence_decoder(x, params_bf16))
    assert jnp.allclose(out_bf16, ref, atol=5e-2, rtol=5e-2), "bf16 mismatch vs reference"

    print("KERNEL_OK")
</pallas_src>

<mosaic_0001>
module attributes {stable_mosaic.version = 11 : i64} {
  func.func @seq_decoder_kernel(%arg0: i32, %arg1: i32, %arg2: memref<32x32xf32, #tpu.memory_space<vmem>>, %arg3: memref<2x96x32xf32, #tpu.memory_space<vmem>>, %arg4: memref<2x1x32xf32, #tpu.memory_space<vmem>>, %arg5: memref<32x384xf32, #tpu.memory_space<vmem>>, %arg6: memref<1x384xf32, #tpu.memory_space<vmem>>, %arg7: memref<32x384xf32, #tpu.memory_space<vmem>>, %arg8: memref<32x32xf32, #tpu.memory_space<vmem>>) attributes {dimension_semantics = [#tpu.dimension_semantics<parallel>, #tpu.dimension_semantics<arbitrary>], iteration_bounds = array<i64: 1, 1>, scalar_prefetch = 0 : i64, scratch_operands = 1 : i64, tpu.core_type = #tpu.core_type<tc>, window_params = [{transform_indices = @transform_0, window_bounds = array<i64: 32, 32>}, {pipeline_mode = #tpu.pipeline_mode<synchronous>, transform_indices = @transform_1, window_bounds = array<i64: 2, 96, 32>}, {pipeline_mode = #tpu.pipeline_mode<synchronous>, transform_indices = @transform_2, window_bounds = array<i64: 2, 1, 32>}, {transform_indices = @transform_3, window_bounds = array<i64: 32, 384>}, {transform_indices = @transform_4, window_bounds = array<i64: 1, 384>}, {transform_indices = @transform_5, window_bounds = array<i64: 32, 384>}]} {
    %c0_i32 = arith.constant 0 : i32
    %0 = arith.cmpi eq, %arg1, %c0_i32 : i32
    %1 = arith.extui %0 : i1 to i32
    %c0_i32_0 = arith.constant 0 : i32
    %2 = arith.cmpi ne, %1, %c0_i32_0 : i32
    scf.if %2 {
      %c0_8 = arith.constant 0 : index
      %c0_9 = arith.constant 0 : index
      %10 = vector.load %arg2[%c0_8, %c0_9] : memref<32x32xf32, #tpu.memory_space<vmem>>, vector<32x32xf32>
      %11 = tpu.iota {dimensions = array<i32: 0>} : vector<32x1xi32>
      %c16_i32 = arith.constant 16 : i32
      %c0_i32_10 = arith.constant 0 : i32
      %12 = arith.cmpi eq, %c16_i32, %c0_i32_10 : i32
      %c1_i32 = arith.constant 1 : i32
      %13 = arith.select %12, %c1_i32, %c16_i32 : i32
      %14 = vector.broadcast %13 : i32 to vector<32x1xi32>
      %15 = arith.remsi %11, %14 : vector<32x1xi32>
      %c0_i32_11 = arith.constant 0 : i32
      %16 = vector.broadcast %c0_i32_11 : i32 to vector<32x1xi32>
      %17 = arith.cmpi ne, %15, %16 : vector<32x1xi32>
      %c0_i32_12 = arith.constant 0 : i32
      %18 = vector.broadcast %c0_i32_12 : i32 to vector<32x1xi32>
      %19 = arith.cmpi slt, %15, %18 : vector<32x1xi32>
      %c0_i32_13 = arith.constant 0 : i32
      %20 = arith.cmpi slt, %13, %c0_i32_13 : i32
      %21 = vector.broadcast %20 : i1 to vector<32x1xi1>
      %22 = vector.broadcast %21 : vector<32x1xi1> to vector<32x1xi1>
      %23 = arith.xori %19, %22 : vector<32x1xi1>
      %24 = arith.andi %23, %17 : vector<32x1xi1>
      %25 = vector.broadcast %13 : i32 to vector<32x1xi32>
      %26 = arith.addi %15, %25 : vector<32x1xi32>
      %27 = arith.select %24, %26, %15 : vector<32x1xi1>, vector<32x1xi32>
      %c-1_i32 = arith.constant -1 : i32
      %28 = vector.broadcast %c-1_i32 : i32 to vector<32x1xi32>
      %29 = arith.addi %27, %28 : vector<32x1xi32>
      %c0_i32_14 = arith.constant 0 : i32
      %30 = vector.broadcast %c0_i32_14 : i32 to vector<32x1xi32>
      %31 = arith.cmpi sge, %29, %30 : vector<32x1xi32>
      %c16_i32_15 = arith.constant 16 : i32
      %32 = vector.broadcast %c16_i32_15 : i32 to vector<32x1xi32>
      %33 = arith.cmpi slt, %29, %32 : vector<32x1xi32>
      %34 = arith.andi %31, %33 : vector<32x1xi1>
      %c1_i32_16 = arith.constant 1 : i32
      %35 = vector.broadcast %c1_i32_16 : i32 to vector<32x1xi32>
      %36 = arith.addi %27, %35 : vector<32x1xi32>
      %c0_i32_17 = arith.constant 0 : i32
      %37 = vector.broadcast %c0_i32_17 : i32 to vector<32x1xi32>
      %38 = arith.cmpi sge, %36, %37 : vector<32x1xi32>
      %c16_i32_18 = arith.constant 16 : i32
      %39 = vector.broadcast %c16_i32_18 : i32 to vector<32x1xi32>
      %40 = arith.cmpi slt, %36, %39 : vector<32x1xi32>
      %41 = arith.andi %38, %40 : vector<32x1xi1>
      %c0_19 = arith.constant 0 : index
      %c0_20 = arith.constant 0 : index
      %c0_21 = arith.constant 0 : index
      %42 = vector.load %arg3[%c0_19, %c0_20, %c0_21] : memref<2x96x32xf32, #tpu.memory_space<vmem>>, vector<1x96x32xf32>
      %43 = vector.shape_cast %42 : vector<1x96x32xf32> to vector<96x32xf32>
      %c1_i32_22 = arith.constant 1 : i32
      %44 = tpu.dynamic_rotate %10 by %c1_i32_22 dim 0 : vector<32x32xf32>, i32 -> vector<32x32xf32>
      %cst_23 = arith.constant 0.000000e+00 : f32
      %45 = vector.shape_cast %34 : vector<32x1xi1> to vector<32x1xi1>
      %46 = vector.broadcast %45 : vector<32x1xi1> to vector<32x32xi1>
      %47 = vector.broadcast %cst_23 : f32 to vector<32x32xf32>
      %48 = arith.select %46, %44, %47 : vector<32x32xi1>, vector<32x32xf32>
      %c31_i32 = arith.constant 31 : i32
      %49 = tpu.dynamic_rotate %10 by %c31_i32 dim 0 : vector<32x32xf32>, i32 -> vector<32x32xf32>
      %cst_24 = arith.constant 0.000000e+00 : f32
      %50 = vector.shape_cast %41 : vector<32x1xi1> to vector<32x1xi1>
      %51 = vector.broadcast %50 : vector<32x1xi1> to vector<32x32xi1>
      %52 = vector.broadcast %cst_24 : f32 to vector<32x32xf32>
      %53 = arith.select %51, %49, %52 : vector<32x32xi1>, vector<32x32xf32>
      %54 = tpu.concatenate %48, %10, %53 in 1 : vector<32x32xf32>, vector<32x32xf32>, vector<32x32xf32> -> vector<32x96xf32>
      %cst_25 = arith.constant dense<0.000000e+00> : vector<32x32xf32>
      %55 = tpu.matmul %54, %43, %cst_25 {dimension_numbers = #tpu.dot_dimension_numbers<[1], [0], [0], [1], [0, 0, 1, 1], [], []>} : vector<32x96xf32>, vector<96x32xf32>, vector<32x32xf32> -> vector<32x32xf32>
      %c0_26 = arith.constant 0 : index
      %c0_27 = arith.constant 0 : index
      %c0_28 = arith.constant 0 : index
      %56 = vector.load %arg4[%c0_26, %c0_27, %c0_28] : memref<2x1x32xf32, #tpu.memory_space<vmem>>, vector<1x1x32xf32>
      %57 = vector.shape_cast %56 : vector<1x1x32xf32> to vector<1x32xf32>
      %58 = vector.broadcast %57 : vector<1x32xf32> to vector<32x32xf32>
      %59 = arith.addf %55, %58 : vector<32x32xf32>
      %cst_29 = arith.constant 5.000000e-01 : f32
      %60 = vector.broadcast %cst_29 : f32 to vector<32x32xf32>
      %61 = arith.mulf %60, %59 : vector<32x32xf32>
      %cst_30 = arith.constant 0.707106769 : f32
      %62 = vector.broadcast %cst_30 : f32 to vector<32x32xf32>
      %63 = arith.mulf %59, %62 : vector<32x32xf32>
      %64 = math.erf %63 : vector<32x32xf32>
      %cst_31 = arith.constant 1.000000e+00 : f32
      %65 = vector.broadcast %cst_31 : f32 to vector<32x32xf32>
      %66 = arith.addf %65, %64 : vector<32x32xf32>
      %67 = arith.mulf %61, %66 : vector<32x32xf32>
      %c1 = arith.constant 1 : index
      %c0_32 = arith.constant 0 : index
      %c0_33 = arith.constant 0 : index
      %68 = vector.load %arg3[%c1, %c0_32, %c0_33] : memref<2x96x32xf32, #tpu.memory_space<vmem>>, vector<1x96x32xf32>
      %69 = vector.shape_cast %68 : vector<1x96x32xf32> to vector<96x32xf32>
      %c1_i32_34 = arith.constant 1 : i32
      %70 = tpu.dynamic_rotate %67 by %c1_i32_34 dim 0 : vector<32x32xf32>, i32 -> vector<32x32xf32>
      %cst_35 = arith.constant 0.000000e+00 : f32
      %71 = vector.shape_cast %34 : vector<32x1xi1> to vector<32x1xi1>
      %72 = vector.broadcast %71 : vector<32x1xi1> to vector<32x32xi1>
      %73 = vector.broadcast %cst_35 : f32 to vector<32x32xf32>
      %74 = arith.select %72, %70, %73 : vector<32x32xi1>, vector<32x32xf32>
      %c31_i32_36 = arith.constant 31 : i32
      %75 = tpu.dynamic_rotate %67 by %c31_i32_36 dim 0 : vector<32x32xf32>, i32 -> vector<32x32xf32>
      %cst_37 = arith.constant 0.000000e+00 : f32
      %76 = vector.shape_cast %41 : vector<32x1xi1> to vector<32x1xi1>
      %77 = vector.broadcast %76 : vector<32x1xi1> to vector<32x32xi1>
      %78 = vector.broadcast %cst_37 : f32 to vector<32x32xf32>
      %79 = arith.select %77, %75, %78 : vector<32x32xi1>, vector<32x32xf32>
      %80 = tpu.concatenate %74, %67, %79 in 1 : vector<32x32xf32>, vector<32x32xf32>, vector<32x32xf32> -> vector<32x96xf32>
      %cst_38 = arith.constant dense<0.000000e+00> : vector<32x32xf32>
      %81 = tpu.matmul %80, %69, %cst_38 {dimension_numbers = #tpu.dot_dimension_numbers<[1], [0], [0], [1], [0, 0, 1, 1], [], []>} : vector<32x96xf32>, vector<96x32xf32>, vector<32x32xf32> -> vector<32x32xf32>
      %c1_39 = arith.constant 1 : index
      %c0_40 = arith.constant 0 : index
      %c0_41 = arith.constant 0 : index
      %82 = vector.load %arg4[%c1_39, %c0_40, %c0_41] : memref<2x1x32xf32, #tpu.memory_space<vmem>>, vector<1x1x32xf32>
      %83 = vector.shape_cast %82 : vector<1x1x32xf32> to vector<1x32xf32>
      %84 = vector.broadcast %83 : vector<1x32xf32> to vector<32x32xf32>
      %85 = arith.addf %81, %84 : vector<32x32xf32>
      %cst_42 = arith.constant 5.000000e-01 : f32
      %86 = vector.broadcast %cst_42 : f32 to vector<32x32xf32>
      %87 = arith.mulf %86, %85 : vector<32x32xf32>
      %cst_43 = arith.constant 0.707106769 : f32
      %88 = vector.broadcast %cst_43 : f32 to vector<32x32xf32>
      %89 = arith.mulf %85, %88 : vector<32x32xf32>
      %90 = math.erf %89 : vector<32x32xf32>
      %cst_44 = arith.constant 1.000000e+00 : f32
      %91 = vector.broadcast %cst_44 : f32 to vector<32x32xf32>
      %92 = arith.addf %91, %90 : vector<32x32xf32>
      %93 = arith.mulf %87, %92 : vector<32x32xf32>
      %c0_45 = arith.constant 0 : index
      %c0_46 = arith.constant 0 : index
      %94 = vector.load %arg8[%c0_45, %c0_46] : memref<32x32xf32, #tpu.memory_space<vmem>>, vector<32x32xf32>
      tpu.vector_store %arg8[%c0_45, %c0_46], %93 {strides = array<i32>} : memref<32x32xf32, #tpu.memory_space<vmem>>, vector<32x32xf32>,
    } else {
    }
    %c0 = arith.constant 0 : index
    %c0_1 = arith.constant 0 : index
    %3 = vector.load %arg8[%c0, %c0_1] : memref<32x32xf32, #tpu.memory_space<vmem>>, vector<32x32xf32>
    %c0_2 = arith.constant 0 : index
    %c0_3 = arith.constant 0 : index
    %4 = vector.load %arg5[%c0_2, %c0_3] : memref<32x384xf32, #tpu.memory_space<vmem>>, vector<32x384xf32>
    %cst = arith.constant dense<0.000000e+00> : vector<32x384xf32>
    %5 = tpu.matmul %3, %4, %cst {dimension_numbers = #tpu.dot_dimension_numbers<[1], [0], [0], [1], [0, 0, 1, 1], [], []>} : vector<32x32xf32>, vector<32x384xf32>, vector<32x384xf32> -> vector<32x384xf32>
    %c0_4 = arith.constant 0 : index
    %c0_5 = arith.constant 0 : index
    %6 = vector.load %arg6[%c0_4, %c0_5] : memref<1x384xf32, #tpu.memory_space<vmem>>, vector<1x384xf32>
    %7 = vector.broadcast %6 : vector<1x384xf32> to vector<32x384xf32>
    %8 = arith.addf %5, %7 : vector<32x384xf32>
    %c0_6 = arith.constant 0 : index
    %c0_7 = arith.constant 0 : index
    %9 = vector.load %arg7[%c0_6, %c0_7] : memref<32x384xf32, #tpu.memory_space<vmem>>, vector<32x384xf32>
    tpu.vector_store %arg7[%c0_6, %c0_7], %8 {strides = array<i32>} : memref<32x384xf32, #tpu.memory_space<vmem>>, vector<32x384xf32>,
    return
  }
  func.func @transform_0(%arg0: i32, %arg1: i32) -> (i32, i32) {
    %c0_i32 = arith.constant 0 : i32
    %c0_i32_0 = arith.constant 0 : i32
    return %arg0, %c0_i32 : i32, i32
  }
  func.func @transform_1(%arg0: i32, %arg1: i32) -> (i32, i32, i32) {
    %c0_i32 = arith.constant 0 : i32
    %c0_i32_0 = arith.constant 0 : i32
    %c0_i32_1 = arith.constant 0 : i32
    %c0_i32_2 = arith.constant 0 : i32
    return %c0_i32, %c0_i32_0, %c0_i32_1 : i32, i32, i32
  }
  func.func @transform_2(%arg0: i32, %arg1: i32) -> (i32, i32, i32) {
    %c0_i32 = arith.constant 0 : i32
    %c0_i32_0 = arith.constant 0 : i32
    %c0_i32_1 = arith.constant 0 : i32
    %c0_i32_2 = arith.constant 0 : i32
    return %c0_i32, %c0_i32_0, %c0_i32_1 : i32, i32, i32
  }
  func.func @transform_3(%arg0: i32, %arg1: i32) -> (i32, i32) {
    %c0_i32 = arith.constant 0 : i32
    %c0_i32_0 = arith.constant 0 : i32
    return %c0_i32, %arg1 : i32, i32
  }
  func.func @transform_4(%arg0: i32, %arg1: i32) -> (i32, i32) {
    %c0_i32 = arith.constant 0 : i32
    %c0_i32_0 = arith.constant 0 : i32
    return %c0_i32, %arg1 : i32, i32
  }
  func.func @transform_5(%arg0: i32, %arg1: i32) -> (i32, i32) {
    %c0_i32 = arith.constant 0 : i32
    return %arg0, %arg1 : i32, i32
  }
}

module attributes {stable_mosaic.version = 11 : i64} {
  func.func @seq_decoder_kernel(%arg0: i32, %arg1: i32, %arg2: memref<32x32xf32, #tpu.memory_space<vmem>>, %arg3: memref<2x96x32xf32, #tpu.memory_space<vmem>>, %arg4: memref<2x1x32xf32, #tpu.memory_space<vmem>>, %arg5: memref<32x384xf32, #tpu.memory_space<vmem>>, %arg6: memref<1x384xf32, #tpu.memory_space<vmem>>, %arg7: memref<32x384xf32, #tpu.memory_space<vmem>>, %arg8: memref<32x32xf32, #tpu.memory_space<vmem>>) attributes {dimension_semantics = [#tpu.dimension_semantics<parallel>, #tpu.dimension_semantics<arbitrary>], iteration_bounds = array<i64: 1, 1>, scalar_prefetch = 0 : i64, scratch_operands = 1 : i64, tpu.core_type = #tpu.core_type<tc>, window_params = [{transform_indices = @transform_0, window_bounds = array<i64: 32, 32>}, {pipeline_mode = #tpu.pipeline_mode<synchronous>, transform_indices = @transform_1, window_bounds = array<i64: 2, 96, 32>}, {pipeline_mode = #tpu.pipeline_mode<synchronous>, transform_indices = @transform_2, window_bounds = array<i64: 2, 1, 32>}, {transform_indices = @transform_3, window_bounds = array<i64: 32, 384>}, {transform_indices = @transform_4, window_bounds = array<i64: 1, 384>}, {transform_indices = @transform_5, window_bounds = array<i64: 32, 384>}]} {
    %c0_i32 = arith.constant 0 : i32
    %0 = arith.cmpi eq, %arg1, %c0_i32 : i32
    %1 = arith.extui %0 : i1 to i32
    %c0_i32_0 = arith.constant 0 : i32
    %2 = arith.cmpi ne, %1, %c0_i32_0 : i32
    scf.if %2 {
      %c0_8 = arith.constant 0 : index
      %c0_9 = arith.constant 0 : index
      %10 = vector.load %arg2[%c0_8, %c0_9] : memref<32x32xf32, #tpu.memory_space<vmem>>, vector<32x32xf32>
      %11 = tpu.iota {dimensions = array<i32: 0>} : vector<32x1xi32>
      %c16_i32 = arith.constant 16 : i32
      %c0_i32_10 = arith.constant 0 : i32
      %12 = arith.cmpi eq, %c16_i32, %c0_i32_10 : i32
      %c1_i32 = arith.constant 1 : i32
      %13 = arith.select %12, %c1_i32, %c16_i32 : i32
      %14 = vector.broadcast %13 : i32 to vector<32x1xi32>
      %15 = arith.remsi %11, %14 : vector<32x1xi32>
      %c0_i32_11 = arith.constant 0 : i32
      %16 = vector.broadcast %c0_i32_11 : i32 to vector<32x1xi32>
      %17 = arith.cmpi ne, %15, %16 : vector<32x1xi32>
      %c0_i32_12 = arith.constant 0 : i32
      %18 = vector.broadcast %c0_i32_12 : i32 to vector<32x1xi32>
      %19 = arith.cmpi slt, %15, %18 : vector<32x1xi32>
      %c0_i32_13 = arith.constant 0 : i32
      %20 = arith.cmpi slt, %13, %c0_i32_13 : i32
      %21 = vector.broadcast %20 : i1 to vector<32x1xi1>
      %22 = vector.broadcast %21 : vector<32x1xi1> to vector<32x1xi1>
      %23 = arith.xori %19, %22 : vector<32x1xi1>
      %24 = arith.andi %23, %17 : vector<32x1xi1>
      %25 = vector.broadcast %13 : i32 to vector<32x1xi32>
      %26 = arith.addi %15, %25 : vector<32x1xi32>
      %27 = arith.select %24, %26, %15 : vector<32x1xi1>, vector<32x1xi32>
      %c-1_i32 = arith.constant -1 : i32
      %28 = vector.broadcast %c-1_i32 : i32 to vector<32x1xi32>
      %29 = arith.addi %27, %28 : vector<32x1xi32>
      %c0_i32_14 = arith.constant 0 : i32
      %30 = vector.broadcast %c0_i32_14 : i32 to vector<32x1xi32>
      %31 = arith.cmpi sge, %29, %30 : vector<32x1xi32>
      %c16_i32_15 = arith.constant 16 : i32
      %32 = vector.broadcast %c16_i32_15 : i32 to vector<32x1xi32>
      %33 = arith.cmpi slt, %29, %32 : vector<32x1xi32>
      %34 = arith.andi %31, %33 : vector<32x1xi1>
      %c1_i32_16 = arith.constant 1 : i32
      %35 = vector.broadcast %c1_i32_16 : i32 to vector<32x1xi32>
      %36 = arith.addi %27, %35 : vector<32x1xi32>
      %c0_i32_17 = arith.constant 0 : i32
      %37 = vector.broadcast %c0_i32_17 : i32 to vector<32x1xi32>
      %38 = arith.cmpi sge, %36, %37 : vector<32x1xi32>
      %c16_i32_18 = arith.constant 16 : i32
      %39 = vector.broadcast %c16_i32_18 : i32 to vector<32x1xi32>
      %40 = arith.cmpi slt, %36, %39 : vector<32x1xi32>
      %41 = arith.andi %38, %40 : vector<32x1xi1>
      %c0_19 = arith.constant 0 : index
      %c0_20 = arith.constant 0 : index
      %c0_21 = arith.constant 0 : index
      %42 = vector.load %arg3[%c0_19, %c0_20, %c0_21] : memref<2x96x32xf32, #tpu.memory_space<vmem>>, vector<1x96x32xf32>
      %43 = vector.shape_cast %42 : vector<1x96x32xf32> to vector<96x32xf32>
      %c1_i32_22 = arith.constant 1 : i32
      %44 = tpu.dynamic_rotate %10 by %c1_i32_22 dim 0 : vector<32x32xf32>, i32 -> vector<32x32xf32>
      %cst_23 = arith.constant 0.000000e+00 : f32
      %45 = vector.shape_cast %34 : vector<32x1xi1> to vector<32x1xi1>
      %46 = vector.broadcast %45 : vector<32x1xi1> to vector<32x32xi1>
      %47 = vector.broadcast %cst_23 : f32 to vector<32x32xf32>
      %48 = arith.select %46, %44, %47 : vector<32x32xi1>, vector<32x32xf32>
      %c31_i32 = arith.constant 31 : i32
      %49 = tpu.dynamic_rotate %10 by %c31_i32 dim 0 : vector<32x32xf32>, i32 -> vector<32x32xf32>
      %cst_24 = arith.constant 0.000000e+00 : f32
      %50 = vector.shape_cast %41 : vector<32x1xi1> to vector<32x1xi1>
      %51 = vector.broadcast %50 : vector<32x1xi1> to vector<32x32xi1>
      %52 = vector.broadcast %cst_24 : f32 to vector<32x32xf32>
      %53 = arith.select %51, %49, %52 : vector<32x32xi1>, vector<32x32xf32>
      %54 = tpu.concatenate %48, %10, %53 in 1 : vector<32x32xf32>, vector<32x32xf32>, vector<32x32xf32> -> vector<32x96xf32>
      %cst_25 = arith.constant dense<0.000000e+00> : vector<32x32xf32>
      %55 = tpu.matmul %54, %43, %cst_25 {dimension_numbers = #tpu.dot_dimension_numbers<[1], [0], [0], [1], [0, 0, 1, 1], [], []>} : vector<32x96xf32>, vector<96x32xf32>, vector<32x32xf32> -> vector<32x32xf32>
      %c0_26 = arith.constant 0 : index
      %c0_27 = arith.constant 0 : index
      %c0_28 = arith.constant 0 : index
      %56 = vector.load %arg4[%c0_26, %c0_27, %c0_28] : memref<2x1x32xf32, #tpu.memory_space<vmem>>, vector<1x1x32xf32>
      %57 = vector.shape_cast %56 : vector<1x1x32xf32> to vector<1x32xf32>
      %58 = vector.broadcast %57 : vector<1x32xf32> to vector<32x32xf32>
      %59 = arith.addf %55, %58 : vector<32x32xf32>
      %cst_29 = arith.constant 5.000000e-01 : f32
      %60 = vector.broadcast %cst_29 : f32 to vector<32x32xf32>
      %61 = arith.mulf %60, %59 : vector<32x32xf32>
      %cst_30 = arith.constant 0.707106769 : f32
      %62 = vector.broadcast %cst_30 : f32 to vector<32x32xf32>
      %63 = arith.mulf %59, %62 : vector<32x32xf32>
      %64 = math.erf %63 : vector<32x32xf32>
      %cst_31 = arith.constant 1.000000e+00 : f32
      %65 = vector.broadcast %cst_31 : f32 to vector<32x32xf32>
      %66 = arith.addf %65, %64 : vector<32x32xf32>
      %67 = arith.mulf %61, %66 : vector<32x32xf32>
      %c1 = arith.constant 1 : index
      %c0_32 = arith.constant 0 : index
      %c0_33 = arith.constant 0 : index
      %68 = vector.load %arg3[%c1, %c0_32, %c0_33] : memref<2x96x32xf32, #tpu.memory_space<vmem>>, vector<1x96x32xf32>
      %69 = vector.shape_cast %68 : vector<1x96x32xf32> to vector<96x32xf32>
      %c1_i32_34 = arith.constant 1 : i32
      %70 = tpu.dynamic_rotate %67 by %c1_i32_34 dim 0 : vector<32x32xf32>, i32 -> vector<32x32xf32>
      %cst_35 = arith.constant 0.000000e+00 : f32
      %71 = vector.shape_cast %34 : vector<32x1xi1> to vector<32x1xi1>
      %72 = vector.broadcast %71 : vector<32x1xi1> to vector<32x32xi1>
      %73 = vector.broadcast %cst_35 : f32 to vector<32x32xf32>
      %74 = arith.select %72, %70, %73 : vector<32x32xi1>, vector<32x32xf32>
      %c31_i32_36 = arith.constant 31 : i32
      %75 = tpu.dynamic_rotate %67 by %c31_i32_36 dim 0 : vector<32x32xf32>, i32 -> vector<32x32xf32>
      %cst_37 = arith.constant 0.000000e+00 : f32
      %76 = vector.shape_cast %41 : vector<32x1xi1> to vector<32x1xi1>
      %77 = vector.broadcast %76 : vector<32x1xi1> to vector<32x32xi1>
      %78 = vector.broadcast %cst_37 : f32 to vector<32x32xf32>
      %79 = arith.select %77, %75, %78 : vector<32x32xi1>, vector<32x32xf32>
      %80 = tpu.concatenate %74, %67, %79 in 1 : vector<32x32xf32>, vector<32x32xf32>, vector<32x32xf32> -> vector<32x96xf32>
      %cst_38 = arith.constant dense<0.000000e+00> : vector<32x32xf32>
      %81 = tpu.matmul %80, %69, %cst_38 {dimension_numbers = #tpu.dot_dimension_numbers<[1], [0], [0], [1], [0, 0, 1, 1], [], []>} : vector<32x96xf32>, vector<96x32xf32>, vector<32x32xf32> -> vector<32x32xf32>
      %c1_39 = arith.constant 1 : index
      %c0_40 = arith.constant 0 : index
      %c0_41 = arith.constant 0 : index
      %82 = vector.load %arg4[%c1_39, %c0_40, %c0_41] : memref<2x1x32xf32, #tpu.memory_space<vmem>>, vector<1x1x32xf32>
      %83 = vector.shape_cast %82 : vector<1x1x32xf32> to vector<1x32xf32>
      %84 = vector.broadcast %83 : vector<1x32xf32> to vector<32x32xf32>
      %85 = arith.addf %81, %84 : vector<32x32xf32>
      %cst_42 = arith.constant 5.000000e-01 : f32
      %86 = vector.broadcast %cst_42 : f32 to vector<32x32xf32>
      %87 = arith.mulf %86, %85 : vector<32x32xf32>
      %cst_43 = arith.constant 0.707106769 : f32
      %88 = vector.broadcast %cst_43 : f32 to vector<32x32xf32>
      %89 = arith.mulf %85, %88 : vector<32x32xf32>
      %90 = math.erf %89 : vector<32x32xf32>
      %cst_44 = arith.constant 1.000000e+00 : f32
      %91 = vector.broadcast %cst_44 : f32 to vector<32x32xf32>
      %92 = arith.addf %91, %90 : vector<32x32xf32>
      %93 = arith.mulf %87, %92 : vector<32x32xf32>
      %c0_45 = arith.constant 0 : index
      %c0_46 = arith.constant 0 : index
      %94 = vector.load %arg8[%c0_45, %c0_46] : memref<32x32xf32, #tpu.memory_space<vmem>>, vector<32x32xf32>
      tpu.vector_store %arg8[%c0_45, %c0_46], %93 {strides = array<i32>} : memref<32x32xf32, #tpu.memory_space<vmem>>, vector<32x32xf32>,
    } else {
    }
    %c0 = arith.constant 0 : index
    %c0_1 = arith.constant 0 : index
    %3 = vector.load %arg8[%c0, %c0_1] : memref<32x32xf32, #tpu.memory_space<vmem>>, vector<32x32xf32>
    %c0_2 = arith.constant 0 : index
    %c0_3 = arith.constant 0 : index
    %4 = vector.load %arg5[%c0_2, %c0_3] : memref<32x384xf32, #tpu.memory_space<vmem>>, vector<32x384xf32>
    %cst = arith.constant dense<0.000000e+00> : vector<32x384xf32>
    %5 = tpu.matmul %3, %4, %cst {dimension_numbers = #tpu.dot_dimension_numbers<[1], [0], [0], [1], [0, 0, 1, 1], [], []>} : vector<32x32xf32>, vector<32x384xf32>, vector<32x384xf32> -> vector<32x384xf32>
    %c0_4 = arith.constant 0 : index
    %c0_5 = arith.constant 0 : index
    %6 = vector.load %arg6[%c0_4, %c0_5] : memref<1x384xf32, #tpu.memory_space<vmem>>, vector<1x384xf32>
    %7 = vector.broadcast %6 : vector<1x384xf32> to vector<32x384xf32>
    %8 = arith.addf %5, %7 : vector<32x384xf32>
    %c0_6 = arith.constant 0 : index
    %c0_7 = arith.constant 0 : index
    %9 = vector.load %arg7[%c0_6, %c0_7] : memref<32x384xf32, #tpu.memory_space<vmem>>, vector<32x384xf32>
    tpu.vector_store %arg7[%c0_6, %c0_7], %8 {strides = array<i32>} : memref<32x384xf32, #tpu.memory_space<vmem>>, vector<32x384xf32>,
    return
  }
  func.func @transform_0(%arg0: i32, %arg1: i32) -> (i32, i32) {
    %c0_i32 = arith.constant 0 : i32
    %c0_i32_0 = arith.constant 0 : i32
    return %arg0, %c0_i32 : i32, i32
  }
  func.func @transform_1(%arg0: i32, %arg1: i32) -> (i32, i32, i32) {
    %c0_i32 = arith.constant 0 : i32
    %c0_i32_0 = arith.constant 0 : i32
    %c0_i32_1 = arith.constant 0 : i32
    %c0_i32_2 = arith.constant 0 : i32
    return %c0_i32, %c0_i32_0, %c0_i32_1 : i32, i32, i32
  }
  func.func @transform_2(%arg0: i32, %arg1: i32) -> (i32, i32, i32) {
    %c0_i32 = arith.constant 0 : i32
    %c0_i32_0 = arith.constant 0 : i32
    %c0_i32_1 = arith.constant 0 : i32
    %c0_i32_2 = arith.constant 0 : i32
    return %c0_i32, %c0_i32_0, %c0_i32_1 : i32, i32, i32
  }
  func.func @transform_3(%arg0: i32, %arg1: i32) -> (i32, i32) {
    %c0_i32 = arith.constant 0 : i32
    %c0_i32_0 = arith.constant 0 : i32
    return %c0_i32, %arg1 : i32, i32
  }
  func.func @transform_4(%arg0: i32, %arg1: i32) -> (i32, i32) {
    %c0_i32 = arith.constant 0 : i32
    %c0_i32_0 = arith.constant 0 : i32
    return %c0_i32, %arg1 : i32, i32
  }
  func.func @transform_5(%arg0: i32, %arg1: i32) -> (i32, i32) {
    %c0_i32 = arith.constant 0 : i32
    return %arg0, %arg1 : i32, i32
  }
}

</mosaic_0001>

<bundles_post_ra>
// kernel: tpu_custom_call.1
= control target key start
LH: loop header
LB: loop body
LE: loop exit
PB: predicated region body
PF: predicated region fallthrough
CT: control target
= control target key end

     0   :  { %v29_v3 = vlaneseq  ;;  %s978_s24 = smov 32   ;;  %s979_s7 = smov 64   ;;  %s1275_s0 = inlined_call_operand.vmem [shape: f32[32,32], index: 0, kind: input, shape index: {}]   ;;  %s1276_s1 = inlined_call_operand.vmem [shape: f32[2,96,32], index: 1, kind: input, shape index: {}]   ;;  %s1277_s2 = inlined_call_operand.vmem [shape: f32[2,1,32], index: 2, kind: input, shape index: {}]   ;;  %s1278_s3 = inlined_call_operand.vmem [shape: f32[32,384], index: 3, kind: input, shape index: {}]   ;;  %s1279_s4 = inlined_call_operand.vmem [shape: f32[1,384], index: 4, kind: input, shape index: {}]   ;;  %s1280_s5 = inlined_call_operand.hbm [shape: f32[32,384], index: 5, kind: output, shape index: {}]  }
   0x1   :  { %v25_v0 = vld [vmem:[%s1275_s0] sm:$0xff]  ;;  %v28_v1 = vld [vmem:[%s1275_s0 + $0x18] sm:$0xff]  ;;  %v26_v2 = vld [vmem:[%s1275_s0 + $0x8] sm:$0xff] }
   0x2   :  { %172 = vrot.lane.b32.xlu0 %v25_v0, %s978_s24  ;;  %v147_v4 = vrot.slane %v25_v0, 1  ;;  %178 = vrot.lane.b32.xlu1 %v28_v1, %s978_s24  ;;  %v27_v5 = vld [vmem:[%s1275_s0 + $0x10] sm:$0xff]  ;;  %v125_v6 = vld [vmem:[%s1276_s1 + $0x58] sm:$0xff]  ;;  %v148_v7 = vrot.slane %v26_v2, 1  ;;  %v1031_v8 = vshrl.u32 %v29_v3, 7  ;;  %v126_v10 = vrot.slane %v25_v0, 7 }
   0x3   :  { %860 = vmatprep.subr.mxu0 %v125_v6  ;;  %v124_v9 = vld [vmem:[%s1276_s1 + $0x50] sm:$0xff]  ;;  %v129_v11 = vrot.slane %v28_v1, 7  ;;  %v127_v12 = vrot.slane %v26_v2, 7  ;;  %v128_v13 = vrot.slane %v27_v5, 7  ;;  %v149_v14 = vrot.slane %v27_v5, 1  ;;  %v123_v17 = vld [vmem:[%s1276_s1 + $0x48] sm:$0xff] }
   0x4   :  { %861 = vmatpush3.msra.mxu0 %v125_v6  ;;  %vm151_vm0 = vcmp.lt.s32.totalorder %v1031_v8, 7  ;;  %v31_v15 = vadd.s32 8, %v1031_v8  ;;  %v33_v16 = vadd.s32 24, %v1031_v8  ;;  %v150_v19 = vrot.slane %v28_v1, 1  ;;  %v122_v22 = vld [vmem:[%s1276_s1 + $0x40] sm:$0xff] }
   0x5   :  { %862 = vmatprep.subr.mxu0 %v124_v9  ;;  %v154_v18 = vsel %vm151_vm0, %v147_v4, %v148_v7  ;;  %vm130_vm1 = vcmp.lt.s32.totalorder %v1031_v8, 1 }
   0x6   :  { %174 = vrot.lane.b32.xlu0 %v26_v2, %s978_s24  ;;  %188 = vrot.lane.b32.xlu1 %v154_v18, %s979_s7  ;;  %v45_v20 = vand.u32 15, %v31_v15  ;;  %v59_v21 = vand.u32 15, %v33_v16  ;;  %v134_v23 = vsel %vm130_vm1, %v129_v11, %v126_v10  ;;  %v1054_v24 = vsel %vm130_vm1, %v128_v13, %v129_v11 }
   0x7   :  { %863 = vmatpush3.msra.mxu0 %v124_v9  ;;  %v1058_v25 = vsel %vm130_vm1, %v126_v10, %v127_v12 }
   0x8   :  { %864 = vmatprep.subr.mxu0 %v123_v17 }
   0x9   :  { %10 = vsyncpa [#allocation4], 0  ;;  %v1060_v26 = vadd.s32 1, %v45_v20  ;;  %v153_v27 = vsel %vm151_vm0, %v148_v7, %v149_v14  ;;  %v1064_v28 = vadd.s32 1, %v59_v21  ;;  %865 = vmatpush3.msra.mxu0 %v123_v17  ;;  %v121_v29 = vld [vmem:[%s1276_s1 + $0x38] sm:$0xff]  ;;  %v132_v30 = vsel %vm130_vm1, %v127_v12, %v128_v13  ;;  %v120_v33 = vld [vmem:[%s1276_s1 + $0x30] sm:$0xff] }
   0xa   :  { %176 = vrot.lane.b32.xlu0 %v27_v5, %s978_s24  ;;  %866 = vmatprep.subr.mxu0 %v122_v22  ;;  %v152_v31 = vsel %vm151_vm0, %v149_v14, %v150_v19  ;;  %v155_v32 = vsel %vm151_vm0, %v150_v19, %v147_v4  ;;  %v119_v35 = vld [vmem:[%s1276_s1 + $0x28] sm:$0xff]  ;;  %v118_v37 = vld [vmem:[%s1276_s1 + $0x20] sm:$0xff]  ;;  %v117_v38 = vld [vmem:[%s1276_s1 + $0x18] sm:$0xff]  ;;  %v38_v42 = vand.u32 15, %v1031_v8  ;;  %v32_v43 = vadd.s32 16, %v1031_v8 }
   0xb   :  { %vm107_vm2 = vcmp.lt.s32.totalorder %v1060_v26, 16  ;;  %vm109_vm3 = vcmp.lt.s32.totalorder %v1064_v28, 16  ;;  %867 = vmatpush3.msra.mxu0 %v122_v22  ;;  %v116_v39 = vld [vmem:[%s1276_s1 + $0x10] sm:$0xff]  ;;  %v115_v40 = vld [vmem:[%s1276_s1 + $0x8] sm:$0xff]  ;;  %v114_v41 = vld [vmem:[%s1276_s1] sm:$0xff]  ;;  %vm200_vm5 = vcmask 261120  }
   0xc   :  { %v165_v34 = vsel %vm107_vm2, %v153_v27, 0.0  ;;  %868 = vmatprep.subr.mxu0 %v121_v29  ;;  %v167_v36 = vsel %vm109_vm3, %v155_v32, 0.0  ;;  %v1108_v44 = vadd.s32 4294967295, %v38_v42  ;;  %v52_v45 = vand.u32 15, %v32_v43  ;;  %v805_v1 = vld [vmem:[%s1276_s1 + $0xb8] sm:$0xff]  ;;  %v804_v2 = vld [vmem:[%s1276_s1 + $0xb0] sm:$0xff] }
   0xd   :  { %190 = vrot.lane.b32.xlu1 %v165_v34, %s979_s7  ;;  %869 = vmatpush3.msra.mxu0 %v121_v29  ;;  %vm205_vm6 = vcmask 523264   ;;  %vm217_vm7 = vcmask 785408   ;;  %v803_v3 = vld [vmem:[%s1276_s1 + $0xa8] sm:$0xff]  ;;  %v802_v4 = vld [vmem:[%s1276_s1 + $0xa0] sm:$0xff]  ;;  %v801_v5 = vld [vmem:[%s1276_s1 + $0x98] sm:$0xff] }
   0xe   :  { %192 = vrot.lane.b32.xlu0 %v152_v31, %s979_s7  ;;  %870 = vmatprep.subr.mxu0 %v120_v33  ;;  %vm86_vm4 = vcmp.ge.s32.totalorder %v1108_v44, 0  ;;  %v1111_v48 = vadd.s32 4294967295, %v52_v45  ;;  %v800_v6 = vld [vmem:[%s1276_s1 + $0x90] sm:$0xff]  ;;  %v799_v7 = vld [vmem:[%s1276_s1 + $0x88] sm:$0xff]  ;;  %v789_v9 = vld [vmem:[%s1277_s2] ss:$0 sm:$0xff] }
   0xf   :  { %871 = vmatpush3.msra.mxu0 %v120_v33  ;;  %v143_v49 = vsel %vm86_vm4, %v134_v23, 0.0  ;;  %890 = vmatprep.subr.mxu1 %v805_v1  ;;  %v798_v22 = vld [vmem:[%s1276_s1 + $0x80] sm:$0xff]  ;;  %v797_v23 = vld [vmem:[%s1276_s1 + $0x78] sm:$0xff] }
  0x10   :  { %872 = vmatprep.subr.mxu0 %v119_v35  ;;  %vm88_vm8 = vcmp.ge.s32.totalorder %v1111_v48, 0  ;;  %891 = vmatpush3.msra.mxu1 %v805_v1  ;;  %v794_v27 = vld [vmem:[%s1276_s1 + $0x60] sm:$0xff]  ;;  %v555_v48 = vld [vmem:[%s1278_s3 + $0x50] sm:$0xff] }
  0x11   :  { %194 = vrot.lane.b32.xlu1 %v167_v36, %s979_s7  ;;  %873 = vmatpush3.msra.mxu0 %v119_v35  ;;  %v145_v54 = vsel %vm88_vm8, %v132_v30, 0.0 }
  0x12   :  { %874 = vmatprep.subr.mxu0 %v118_v37  ;;  %892 = vmatprep.subr.mxu1 %v804_v2 }
  0x13   :  { %875 = vmatpush3.msra.mxu0 %v118_v37  ;;  %893 = vmatpush3.msra.mxu1 %v804_v2 }
  0x14   :  { %876 = vmatprep.subr.mxu0 %v117_v38  ;;  %894 = vmatprep.subr.mxu1 %v803_v3 }
  0x15   :  { %877 = vmatpush3.msra.mxu0 %v117_v38  ;;  %895 = vmatpush3.msra.mxu1 %v803_v3 }
  0x16   :  { %878 = vmatprep.subr.mxu0 %v116_v39  ;;  %896 = vmatprep.subr.mxu1 %v802_v4 }
  0x17   :  { %879 = vmatpush3.msra.mxu0 %v116_v39  ;;  %897 = vmatpush3.msra.mxu1 %v802_v4 }
  0x18   :  { %880 = vmatprep.subr.mxu0 %v115_v40  ;;  %898 = vmatprep.subr.mxu1 %v801_v5 }
  0x19   :  { %881 = vmatpush3.msra.mxu0 %v115_v40  ;;  %899 = vmatpush3.msra.mxu1 %v801_v5 }
  0x1a   :  { %882 = vmatprep.subr.mxu0 %v114_v41  ;;  %900 = vmatprep.subr.mxu1 %v800_v6 }
  0x1b   :  { %883 = vmatpush3.msra.mxu0 %v114_v41  ;;  %901 = vmatpush3.msra.mxu1 %v800_v6 }
  0x1c   :  { %902 = vmatprep.subr.mxu1 %v799_v7  ;;  %611 = vmatprep.subr.mxu0 %v555_v48 }
  0x1d   :  { %903 = vmatpush3.msra.mxu1 %v799_v7 }
  0x1e   :  { %904 = vmatprep.subr.mxu1 %v798_v22 }
  0x1f   :  { %905 = vmatpush3.msra.mxu1 %v798_v22  ;;  %v549_v22 = vld [vmem:[%s1278_s3 + $0x20] sm:$0xff] }
  0x20   :  { %906 = vmatprep.subr.mxu1 %v797_v23 }
  0x21   :  { %907 = vmatpush3.msra.mxu1 %v797_v23  ;;  %v548_v23 = vld [vmem:[%s1278_s3 + $0x18] sm:$0xff] }
  0x74   :  { %v173_v46 = vpop.permute.xlu0 %172  ;;  %v179_v47 = vpop.permute.xlu1 %178 }
  0x75   :  { %v201_v51 = vsel %vm200_vm5, %v143_v49, %v173_v46  ;;  %v204_v62 = vsel %vm200_vm5, %v1054_v24, %v179_v47  ;;  %v796_v24 = vld [vmem:[%s1276_s1 + $0x70] sm:$0xff] }
  0x76   :  { %908 = vmatprep.subr.mxu1 %v796_v24 }
  0x77   :  { %909 = vmatpush3.msra.mxu1 %v796_v24  ;;  %v550_v24 = vld [vmem:[%s1278_s3 + $0x28] sm:$0xff] }
  0x78   :  { %v175_v50 = vpop.permute.xlu0 %174  ;;  %v189_v52 = vpop.permute.xlu1 %188 }
  0x79   :  { %v206_v53 = vsel %vm205_vm6, %v201_v51, %v189_v52  ;;  %v202_v57 = vsel %vm200_vm5, %v1058_v25, %v175_v50  ;;  %v795_v25 = vld [vmem:[%s1276_s1 + $0x68] sm:$0xff] }
  0x7a   :  { %884 = vmatprep.mubr.msk.f32.mxu0 %vm217_vm7, %v206_v53  ;;  %910 = vmatprep.subr.mxu1 %v795_v25 }
  0x7b   :  { %911 = vmatpush3.msra.mxu1 %v795_v25  ;;  %v546_v25 = vld [vmem:[%s1278_s3 + $0x8] sm:$0xff] }
  0x7c   :  { %v177_v55 = vpop.permute.xlu0 %176  ;;  %912 = vmatprep.subr.mxu1 %v794_v27 }
  0x7d   :  { %v203_v56 = vsel %vm200_vm5, %v145_v54, %v177_v55  ;;  %913 = vmatpush3.msra.mxu1 %v794_v27  ;;  %v545_v27 = vld [vmem:[%s1278_s3] sm:$0xff] }
  0x7f   :  { %v191_v58 = vpop.permute.xlu1 %190 }
  0x80   :  { %v207_v59 = vsel %vm205_vm6, %v202_v57, %v191_v58  ;;  %v193_v60 = vpop.permute.xlu0 %192 }
  0x81   :  { %v208_v61 = vsel %vm205_vm6, %v203_v56, %v193_v60  ;;  %885 = vmatmul.mubr.msk.f32.vlgmr.msra.gmra.mxu0 %vm217_vm7, %v207_v59 }
  0x82   :  { %887 = vmatprep.mubr.msk.f32.mxu0 %vm217_vm7, %v208_v61 }
  0x83   :  { %v195_v63 = vpop.permute.xlu1 %194 }
  0x84   :  { %v209_v0 = vsel %vm205_vm6, %v204_v62, %v195_v63 }
  0x85   :  { %888 = vmatmul.mubr.msk.f32.gmra.mxu0 %vm217_vm7, %v209_v0 }
 0x141   :  { %v886_v10 = vpop.f32.mrf.mxu0 }
 0x142   :  { %v302_v11 = vadd.f32 %v886_v10, %v789_v9 }
 0x143   :  { %v296_v12 = vpop.f32.mrf.mxu0 }
 0x144   :  { %v320_v13 = vmul.f32 0.70710677, %v302_v11  ;;  %v297_v14 = vadd.f32 %v789_v9, %v296_v12  ;;  %v316_v30 = vmul.f32 0.5, %v302_v11 }
 0x145   :  { %v889_v15 = vpop.f32.mrf.mxu0 }
 0x146   :  { %940 = verf.f32 %v320_v13  ;;  %v319_v16 = vmul.f32 0.70710677, %v297_v14  ;;  %v312_v17 = vadd.f32 %v889_v15, %v789_v9  ;;  %v315_v33 = vmul.f32 0.5, %v297_v14 }
 0x147   :  { %v306_v18 = vpop.f32.mrf.mxu0 }
 0x148   :  { %942 = verf.f32 %v319_v16  ;;  %v322_v19 = vmul.f32 0.70710677, %v312_v17  ;;  %v307_v20 = vadd.f32 %v789_v9, %v306_v18  ;;  %v318_v37 = vmul.f32 0.5, %v312_v17  ;;  %v554_v17 = vld [vmem:[%s1278_s3 + $0x48] sm:$0xff]  ;;  %v556_v18 = vld [vmem:[%s1278_s3 + $0x58] sm:$0xff] }
 0x149   :  { %612 = vmatpush1.msra.mxu0 %v554_v17  ;;  %920 = vmatprep.subr.mxu1 %v556_v18 }
 0x14a   :  { %944 = verf.f32 %v322_v19  ;;  %v321_v21 = vmul.f32 0.70710677, %v307_v20  ;;  %v317_v41 = vmul.f32 0.5, %v307_v20  ;;  %v552_v19 = vld [vmem:[%s1278_s3 + $0x38] sm:$0xff]  ;;  %v551_v20 = vld [vmem:[%s1278_s3 + $0x30] sm:$0xff] }
 0x14b   :  { %613 = vmatprep.subr.mxu0 %v552_v19 }
 0x14c   :  { %946 = verf.f32 %v321_v21  ;;  %v553_v21 = vld [vmem:[%s1278_s3 + $0x40] sm:$0xff]  ;;  %614 = vmatpush1.msra.mxu0 %v551_v20 }
 0x14d   :  { %615 = vmatprep.subr.mxu0 %v549_v22 }
 0x14e   :  { %616 = vmatpush1.msra.mxu0 %v548_v23 }
 0x14f   :  { %617 = vmatprep.subr.mxu0 %v546_v25 }
 0x150   :  { %618 = vmatpush1.msra.mxu0 %v545_v27 }
 0x153   :  { %v941_v29 = vpop.eup %940 }
 0x154   :  { %v328_v31 = vadd.f32 1.0, %v941_v29  ;;  %v547_v29 = vld [vmem:[%s1278_s3 + $0x10] sm:$0xff] }
 0x155   :  { %v943_v32 = vpop.eup %942 }
 0x156   :  { %v332_v34 = vmul.f32 %v328_v31, %v316_v30  ;;  %v327_v35 = vadd.f32 1.0, %v943_v32  ;;  %v980_v30 = vmov 0.0   ;;  %v807_v31 = vld [vmem:[%s1277_s2 + $0x1] ss:$0 sm:$0xff] }
 0x157   :  { %v945_v36 = vpop.eup %944  ;;  %651 = vmatprep.mubr.f32.mxu0 %v980_v30 }
 0x158   :  { %378 = vrot.lane.b32.xlu1 %v332_v34, %s978_s24  ;;  %v331_v38 = vmul.f32 %v327_v35, %v315_v33  ;;  %v330_v39 = vadd.f32 1.0, %v945_v36  ;;  %v361_v42 = vrot.slane %v332_v34, 1  ;;  %v349_v49 = vrot.slane %v332_v34, 7 }
 0x159   :  { %v947_v40 = vpop.eup %946 }
 0x15a   :  { %v329_v43 = vadd.f32 1.0, %v947_v40  ;;  %376 = vrot.lane.b32.xlu0 %v331_v38, %s978_s24  ;;  %v360_v45 = vrot.slane %v331_v38, 1  ;;  %v334_v46 = vmul.f32 %v330_v39, %v318_v37  ;;  %v348_v47 = vrot.slane %v331_v38, 7 }
 0x15c   :  { %v333_v50 = vmul.f32 %v329_v43, %v317_v41  ;;  %v366_v51 = vsel %vm151_vm0, %v360_v45, %v361_v42  ;;  %v351_v52 = vrot.slane %v334_v46, 7  ;;  %v354_v53 = vsel %vm130_vm1, %v348_v47, %v349_v49 }
 0x15d   :  { %v363_v61 = vrot.slane %v334_v46, 1 }
 0x15e   :  { %v350_v54 = vrot.slane %v333_v50, 7  ;;  %392 = vrot.lane.b32.xlu0 %v366_v51, %s979_s7  ;;  %v362_v55 = vrot.slane %v333_v50, 1  ;;  %v355_v56 = vsel %vm130_vm1, %v351_v52, %v348_v47 }
 0x15f   :  { %v367_v63 = vsel %vm151_vm0, %v363_v61, %v360_v45  ;;  %v356_v1 = vsel %vm86_vm4, %v355_v56, 0.0 }
 0x160   :  { %v365_v57 = vsel %vm151_vm0, %v361_v42, %v362_v55  ;;  %v353_v58 = vsel %vm130_vm1, %v349_v49, %v350_v54  ;;  %v352_v59 = vsel %vm130_vm1, %v350_v54, %v351_v52  ;;  %v364_v62 = vsel %vm151_vm0, %v362_v55, %v363_v61 }
 0x161   :  { %v369_v60 = vsel %vm107_vm2, %v365_v57, 0.0  ;;  %v371_v0 = vsel %vm109_vm3, %v367_v63, 0.0  ;;  %v358_v44 = vsel %vm88_vm8, %v353_v58, 0.0 }
 0x162   :  { %394 = vrot.lane.b32.xlu1 %v369_v60, %s979_s7  ;;  %380 = vrot.lane.b32.xlu0 %v333_v50, %s978_s24 }
 0x166   :  { %382 = vrot.lane.b32.xlu1 %v334_v46, %s978_s24  ;;  %396 = vrot.lane.b32.xlu0 %v364_v62, %s979_s7 }
 0x16a   :  { %398 = vrot.lane.b32.xlu1 %v371_v0, %s979_s7 }
 0x1ca   :  { %v379_v2 = vpop.permute.xlu1 %378 }
 0x1cb   :  { %v405_v6 = vsel %vm200_vm5, %v354_v53, %v379_v2  ;;  %v557_v2 = vld [vmem:[%s1279_s4] sm:$0x7]  ;;  %s981_s4 = smov [#allocation3]  }
 0x1cc   :  { %v377_v26 = vpop.permute.xlu0 %376  ;;  %s778_s28 = sshll.u32 %s981_s4, 4  ;;  %s779_s28 = int_to_ptr.vmem [resolvable:$true] %s778_s28 }
 0x1cd   :  { %v404_v3 = vsel %vm200_vm5, %v356_v1, %v377_v26  ;;  %v561_v1 = vsub.s32 0, %v1031_v8  ;;  %s956_s1 = scalar_lea.vmem %s779_s28, 1536  ;;  %p961_p1 = scmp.lt.s32.totalorder %s779_s28, %s779_s28 }
 0x1ce   :  { %p957_p0 = scmp.ne.s32.totalorder %s779_s28, %s956_s1  ;;  %p962_p2 = scmp.lt.s32.totalorder %s956_s1, %s956_s1 }
 0x1d0   :  { %v393_v4 = vpop.permute.xlu0 %392  ;;  %p963_p3 = por %p962_p2, %p961_p1 }
 0x1d1   :  { %v408_v5 = vsel %vm205_vm6, %v404_v3, %v393_v4  ;;  %v569_v3 = vsub.s32 2, %v1031_v8  ;;  %v565_v4 = vsub.s32 1, %v1031_v8 }
 0x1d2   :  { %914 = vmatprep.mubr.msk.f32.mxu1 %vm217_vm7, %v408_v5  ;;  %v562_v5 = vrot.slane %v557_v2, %v561_v1  ;;  %p964_p4 = pnand %p963_p3, %p957_p0 }
 0x1d4   :  { %v395_v7 = vpop.permute.xlu1 %394  ;;  %v381_v9 = vpop.permute.xlu0 %380 }
 0x1d5   :  { %v409_v28 = vsel %vm205_vm6, %v405_v6, %v395_v7  ;;  %v406_v10 = vsel %vm200_vm5, %v358_v44, %v381_v9  ;;  %v570_v6 = vrot.slane %v557_v2, %v569_v3  ;;  %v566_v7 = vrot.slane %v557_v2, %v565_v4 }
 0x1d6   :  { %915 = vmatmul.mubr.msk.f32.vlgmr.msra.gmra.mxu1 %vm217_vm7, %v409_v28 }
 0x1d7   :  { %921 = vmatpush3.msra.mxu1 %v556_v18 }
 0x1d8   :  { %v383_v11 = vpop.permute.xlu1 %382  ;;  %v397_v12 = vpop.permute.xlu0 %396  ;;  %922 = vmatprep.subr.mxu1 %v553_v21 }
 0x1d9   :  { %v410_v13 = vsel %vm205_vm6, %v406_v10, %v397_v12  ;;  %v407_v14 = vsel %vm200_vm5, %v352_v59, %v383_v11  ;;  %923 = vmatpush3.msra.mxu1 %v553_v21 }
 0x1da   :  { %917 = vmatprep.mubr.msk.f32.mxu1 %vm217_vm7, %v410_v13  ;;  %924 = vmatprep.subr.mxu1 %v550_v24 }
 0x1db   :  { %925 = vmatpush3.msra.mxu1 %v550_v24 }
 0x1dc   :  { %v399_v15 = vpop.permute.xlu1 %398  ;;  %926 = vmatprep.subr.mxu1 %v547_v29 }
 0x1dd   :  { %v411_v16 = vsel %vm205_vm6, %v407_v14, %v399_v15  ;;  %927 = vmatpush3.msra.mxu1 %v547_v29 }
 0x1de   :  { %918 = vmatmul.mubr.msk.f32.gmra.mxu1 %vm217_vm7, %v411_v16 }
 0x296   :  { %v916_v32 = vpop.f32.mrf.mxu1 }
 0x297   :  { %v504_v33 = vadd.f32 %v916_v32, %v807_v31 }
 0x298   :  { %v498_v34 = vpop.f32.mrf.mxu1 }
 0x299   :  { %v522_v35 = vmul.f32 0.70710677, %v504_v33  ;;  %v499_v36 = vadd.f32 %v807_v31, %v498_v34  ;;  %v518_v46 = vmul.f32 0.5, %v504_v33 }
 0x29b   :  { %948 = verf.f32 %v522_v35  ;;  %v521_v37 = vmul.f32 0.70710677, %v499_v36  ;;  %v517_v51 = vmul.f32 0.5, %v499_v36 }
 0x29d   :  { %950 = verf.f32 %v521_v37 }
 0x29e   :  { %v919_v38 = vpop.f32.mrf.mxu1 }
 0x29f   :  { %v514_v39 = vadd.f32 %v919_v38, %v807_v31 }
 0x2a0   :  { %v508_v40 = vpop.f32.mrf.mxu1 }
 0x2a1   :  { %v524_v41 = vmul.f32 0.70710677, %v514_v39  ;;  %v509_v42 = vadd.f32 %v807_v31, %v508_v40  ;;  %v520_v55 = vmul.f32 0.5, %v514_v39 }
 0x2a3   :  { %952 = verf.f32 %v524_v41  ;;  %v523_v43 = vmul.f32 0.70710677, %v509_v42  ;;  %v519_v59 = vmul.f32 0.5, %v509_v42 }
 0x2a5   :  { %954 = verf.f32 %v523_v43 }
 0x2a8   :  { %v949_v45 = vpop.eup %948 }
 0x2a9   :  { %v530_v47 = vadd.f32 1.0, %v949_v45 }
 0x2aa   :  { %v951_v49 = vpop.eup %950 }
 0x2ab   :  { %v534_v50 = vmul.f32 %v530_v47, %v518_v46  ;;  %v529_v52 = vadd.f32 1.0, %v951_v49 }
 0x2ad   :  { %538 = vst.msk [vmem:[#allocation2 + $0x8] sm:$0xff] %vm200_vm5, %v534_v50  ;;  %v533_v53 = vmul.f32 %v529_v52, %v517_v51 }
 0x2af   :  { %537 = vst.msk [vmem:[#allocation2] sm:$0xff] %vm200_vm5, %v533_v53 }
 0x2b0   :  { %v953_v54 = vpop.eup %952 }
 0x2b1   :  { %v532_v56 = vadd.f32 1.0, %v953_v54 }
 0x2b2   :  { %v955_v57 = vpop.eup %954 }
 0x2b3   :  { %v536_v58 = vmul.f32 %v532_v56, %v520_v55  ;;  %v531_v60 = vadd.f32 1.0, %v955_v57 }
 0x2b4   :  { %v542_v63 = vld [vmem:[#allocation2 + $0x8] sm:$0xff] }
 0x2b5   :  { %540 = vst.msk [vmem:[#allocation2 + $0x18] sm:$0xff] %vm200_vm5, %v536_v58  ;;  %v535_v61 = vmul.f32 %v531_v60, %v519_v59 }
 0x2b6   :  { %v541_v62 = vld [vmem:[#allocation2] sm:$0xff] }
 0x2b7   :  { %539 = vst.msk [vmem:[#allocation2 + $0x10] sm:$0xff] %vm200_vm5, %v535_v61  ;;  %812 = vmatmul.mubr.msk.f32.vlgmr.msra.gmra.mxu0 %vm200_vm5, %v541_v62  ;;  %928 = vmatprep.mubr.msk.f32.mxu1 %vm200_vm5, %v541_v62 }
 0x2b8   :  { %929 = vmatmul.mubr.msk.f32.vlgmr.msra.gmra.mxu1 %vm200_vm5, %v542_v63  ;;  %657 = vmatprep.mubr.f32.mxu0 %v980_v30 }
 0x2bb   :  { %813 = vmatmul.mubr.msk.f32.gmra.mxu0 %vm200_vm5, %v542_v63 }
 0x2bc   :  { %663 = vmatprep.mubr.f32.mxu0 %v980_v30  ;;  %v544_v26 = vld [vmem:[#allocation2 + $0x18] sm:$0xff] }
 0x2be   :  { %v543_v0 = vld [vmem:[#allocation2 + $0x10] sm:$0xff] }
 0x2bf   :  { %814 = vmatmul.mubr.msk.f32.gmra.mxu0 %vm200_vm5, %v543_v0  ;;  %931 = vmatprep.mubr.msk.f32.mxu1 %vm200_vm5, %v543_v0 }
 0x2c0   :  { %932 = vmatmul.mubr.msk.f32.gmra.mxu1 %vm200_vm5, %v544_v26  ;;  %669 = vmatprep.mubr.f32.mxu0 %v980_v30 }
 0x2c3   :  { %815 = vmatmul.mubr.msk.f32.gmra.mxu0 %vm200_vm5, %v544_v26 }
 0x377   :  { %v653_v9 = vpop.f32.mrf.mxu0 }
 0x378   :  { %v654_v28 = vadd.f32 %v653_v9, %v562_v5  ;;  %v930_v44 = vpop.f32.mrf.mxu1 }
 0x379   :  { %v748_v10 = vadd.f32 %v930_v44, %v570_v6  ;;  %v655_v11 = vpop.f32.mrf.mxu0 }
 0x37a   :  { %761 = vst [vmem:[#allocation3] sm:$0xff] %v654_v28  ;;  %v656_v12 = vadd.f32 %v655_v11, %v566_v7  ;;  %v742_v13 = vpop.f32.mrf.mxu1 }
 0x37b   :  { %766 = vst [vmem:[#allocation3 + $0x28] sm:$0xff] %v748_v10  ;;  %v743_v14 = vadd.f32 %v742_v13, %v570_v6  ;;  %v659_v15 = vpop.f32.mrf.mxu0 }
 0x37c   :  { %762 = vst [vmem:[#allocation3 + $0x8] sm:$0xff] %v656_v12  ;;  %v660_v16 = vadd.f32 %v659_v15, %v562_v5 }
 0x37d   :  { %763 = vst [vmem:[#allocation3 + $0x10] sm:$0xff] %v743_v14  ;;  %v661_v48 = vpop.f32.mrf.mxu0 }
 0x37e   :  { %764 = vst [vmem:[#allocation3 + $0x18] sm:$0xff] %v660_v16  ;;  %v662_v8 = vadd.f32 %v661_v48, %v566_v7 }
 0x37f   :  { %v665_v17 = vpop.f32.mrf.mxu0 }
 0x380   :  { %765 = vst [vmem:[#allocation3 + $0x20] sm:$0xff] %v662_v8  ;;  %v666_v18 = vadd.f32 %v665_v17, %v562_v5  ;;  %v933_v19 = vpop.f32.mrf.mxu1 }
 0x381   :  { %v758_v20 = vadd.f32 %v933_v19, %v570_v6  ;;  %v667_v21 = vpop.f32.mrf.mxu0 }
 0x382   :  { %767 = vst [vmem:[#allocation3 + $0x30] sm:$0xff] %v666_v18  ;;  %v668_v22 = vadd.f32 %v667_v21, %v566_v7  ;;  %v752_v23 = vpop.f32.mrf.mxu1 }
 0x383   :  { %772 = vst [vmem:[#allocation3 + $0x58] sm:$0xff] %v758_v20  ;;  %v753_v24 = vadd.f32 %v752_v23, %v570_v6  ;;  %v671_v25 = vpop.f32.mrf.mxu0 }
 0x384   :  { %768 = vst [vmem:[#allocation3 + $0x38] sm:$0xff] %v668_v22  ;;  %v672_v27 = vadd.f32 %v671_v25, %v562_v5 }
 0x385   :  { %769 = vst [vmem:[#allocation3 + $0x40] sm:$0xff] %v753_v24  ;;  %v673_v29 = vpop.f32.mrf.mxu0 }
 0x386   :  { %770 = vst [vmem:[#allocation3 + $0x48] sm:$0xff] %v672_v27  ;;  %v674_v30 = vadd.f32 %v673_v29, %v566_v7 }
 0x388   :  { %771 = vst [vmem:[#allocation3 + $0x50] sm:$0xff] %v674_v30 }
 0x389   :  { %967 = shalt.err (!%p964_p4)
}
 0x38a   :  { %s982_s24 = smov 384   ;;  %s983_s7 = smov 24  }
 0x38b   :  { %784 = dma.vmem_to_hbm [thread:$0]  %s779_s28, 1536, %s1280_s5, [#allocation4], %s982_s24, %s982_s24, %s983_s7  }
 0x38c   :  { %976 = dma.done.wait [#allocation4], 1536  }
 0x38d   :  { %977 = vsyncadd [#allocation4], 4294965760 }
 0x38e   :  { %788 = vsyncpa [#allocation4], 1 }

// kernel: tpu_custom_call.1
= control target key start
LH: loop header
LB: loop body
LE: loop exit
PB: predicated region body
PF: predicated region fallthrough
CT: control target
= control target key end

     0   :  { %v29_v3 = vlaneseq  ;;  %s978_s24 = smov 32   ;;  %s979_s7 = smov 64   ;;  %s1275_s0 = inlined_call_operand.vmem [shape: f32[32,32], index: 0, kind: input, shape index: {}]   ;;  %s1276_s1 = inlined_call_operand.vmem [shape: f32[2,96,32], index: 1, kind: input, shape index: {}]   ;;  %s1277_s2 = inlined_call_operand.vmem [shape: f32[2,1,32], index: 2, kind: input, shape index: {}]   ;;  %s1278_s3 = inlined_call_operand.vmem [shape: f32[32,384], index: 3, kind: input, shape index: {}]   ;;  %s1279_s4 = inlined_call_operand.vmem [shape: f32[1,384], index: 4, kind: input, shape index: {}]   ;;  %s1280_s5 = inlined_call_operand.hbm [shape: f32[32,384], index: 5, kind: output, shape index: {}]  }
   0x1   :  { %v25_v0 = vld [vmem:[%s1275_s0] sm:$0xff]  ;;  %v28_v1 = vld [vmem:[%s1275_s0 + $0x18] sm:$0xff]  ;;  %v26_v2 = vld [vmem:[%s1275_s0 + $0x8] sm:$0xff] }
   0x2   :  { %172 = vrot.lane.b32.xlu0 %v25_v0, %s978_s24  ;;  %v147_v4 = vrot.slane %v25_v0, 1  ;;  %178 = vrot.lane.b32.xlu1 %v28_v1, %s978_s24  ;;  %v27_v5 = vld [vmem:[%s1275_s0 + $0x10] sm:$0xff]  ;;  %v125_v6 = vld [vmem:[%s1276_s1 + $0x58] sm:$0xff]  ;;  %v148_v7 = vrot.slane %v26_v2, 1  ;;  %v1031_v8 = vshrl.u32 %v29_v3, 7  ;;  %v126_v10 = vrot.slane %v25_v0, 7 }
   0x3   :  { %860 = vmatprep.subr.mxu0 %v125_v6  ;;  %v124_v9 = vld [vmem:[%s1276_s1 + $0x50] sm:$0xff]  ;;  %v129_v11 = vrot.slane %v28_v1, 7  ;;  %v127_v12 = vrot.slane %v26_v2, 7  ;;  %v128_v13 = vrot.slane %v27_v5, 7  ;;  %v149_v14 = vrot.slane %v27_v5, 1  ;;  %v123_v17 = vld [vmem:[%s1276_s1 + $0x48] sm:$0xff] }
   0x4   :  { %861 = vmatpush3.msra.mxu0 %v125_v6  ;;  %vm151_vm0 = vcmp.lt.s32.totalorder %v1031_v8, 7  ;;  %v31_v15 = vadd.s32 8, %v1031_v8  ;;  %v33_v16 = vadd.s32 24, %v1031_v8  ;;  %v150_v19 = vrot.slane %v28_v1, 1  ;;  %v122_v22 = vld [vmem:[%s1276_s1 + $0x40] sm:$0xff] }
   0x5   :  { %862 = vmatprep.subr.mxu0 %v124_v9  ;;  %v154_v18 = vsel %vm151_vm0, %v147_v4, %v148_v7  ;;  %vm130_vm1 = vcmp.lt.s32.totalorder %v1031_v8, 1 }
   0x6   :  { %174 = vrot.lane.b32.xlu0 %v26_v2, %s978_s24  ;;  %188 = vrot.lane.b32.xlu1 %v154_v18, %s979_s7  ;;  %v45_v20 = vand.u32 15, %v31_v15  ;;  %v59_v21 = vand.u32 15, %v33_v16  ;;  %v134_v23 = vsel %vm130_vm1, %v129_v11, %v126_v10  ;;  %v1054_v24 = vsel %vm130_vm1, %v128_v13, %v129_v11 }
   0x7   :  { %863 = vmatpush3.msra.mxu0 %v124_v9  ;;  %v1058_v25 = vsel %vm130_vm1, %v126_v10, %v127_v12 }
   0x8   :  { %864 = vmatprep.subr.mxu0 %v123_v17 }
   0x9   :  { %10 = vsyncpa [#allocation4], 0  ;;  %v1060_v26 = vadd.s32 1, %v45_v20  ;;  %v153_v27 = vsel %vm151_vm0, %v148_v7, %v149_v14  ;;  %v1064_v28 = vadd.s32 1, %v59_v21  ;;  %865 = vmatpush3.msra.mxu0 %v123_v17  ;;  %v121_v29 = vld [vmem:[%s1276_s1 + $0x38] sm:$0xff]  ;;  %v132_v30 = vsel %vm130_vm1, %v127_v12, %v128_v13  ;;  %v120_v33 = vld [vmem:[%s1276_s1 + $0x30] sm:$0xff] }
   0xa   :  { %176 = vrot.lane.b32.xlu0 %v27_v5, %s978_s24  ;;  %866 = vmatprep.subr.mxu0 %v122_v22  ;;  %v152_v31 = vsel %vm151_vm0, %v149_v14, %v150_v19  ;;  %v155_v32 = vsel %vm151_vm0, %v150_v19, %v147_v4  ;;  %v119_v35 = vld [vmem:[%s1276_s1 + $0x28] sm:$0xff]  ;;  %v118_v37 = vld [vmem:[%s1276_s1 + $0x20] sm:$0xff]  ;;  %v117_v38 = vld [vmem:[%s1276_s1 + $0x18] sm:$0xff]  ;;  %v38_v42 = vand.u32 15, %v1031_v8  ;;  %v32_v43 = vadd.s32 16, %v1031_v8 }
   0xb   :  { %vm107_vm2 = vcmp.lt.s32.totalorder %v1060_v26, 16  ;;  %vm109_vm3 = vcmp.lt.s32.totalorder %v1064_v28, 16  ;;  %867 = vmatpush3.msra.mxu0 %v122_v22  ;;  %v116_v39 = vld [vmem:[%s1276_s1 + $0x10] sm:$0xff]  ;;  %v115_v40 = vld [vmem:[%s1276_s1 + $0x8] sm:$0xff]  ;;  %v114_v41 = vld [vmem:[%s1276_s1] sm:$0xff]  ;;  %vm200_vm5 = vcmask 261120  }
   0xc   :  { %v165_v34 = vsel %vm107_vm2, %v153_v27, 0.0  ;;  %868 = vmatprep.subr.mxu0 %v121_v29  ;;  %v167_v36 = vsel %vm109_vm3, %v155_v32, 0.0  ;;  %v1108_v44 = vadd.s32 4294967295, %v38_v42  ;;  %v52_v45 = vand.u32 15, %v32_v43  ;;  %v805_v1 = vld [vmem:[%s1276_s1 + $0xb8] sm:$0xff]  ;;  %v804_v2 = vld [vmem:[%s1276_s1 + $0xb0] sm:$0xff] }
   0xd   :  { %190 = vrot.lane.b32.xlu1 %v165_v34, %s979_s7  ;;  %869 = vmatpush3.msra.mxu0 %v121_v29  ;;  %vm205_vm6 = vcmask 523264   ;;  %vm217_vm7 = vcmask 785408   ;;  %v803_v3 = vld [vmem:[%s1276_s1 + $0xa8] sm:$0xff]  ;;  %v802_v4 = vld [vmem:[%s1276_s1 + $0xa0] sm:$0xff]  ;;  %v801_v5 = vld [vmem:[%s1276_s1 + $0x98] sm:$0xff] }
   0xe   :  { %192 = vrot.lane.b32.xlu0 %v152_v31, %s979_s7  ;;  %870 = vmatprep.subr.mxu0 %v120_v33  ;;  %vm86_vm4 = vcmp.ge.s32.totalorder %v1108_v44, 0  ;;  %v1111_v48 = vadd.s32 4294967295, %v52_v45  ;;  %v800_v6 = vld [vmem:[%s1276_s1 + $0x90] sm:$0xff]  ;;  %v799_v7 = vld [vmem:[%s1276_s1 + $0x88] sm:$0xff]  ;;  %v789_v9 = vld [vmem:[%s1277_s2] ss:$0 sm:$0xff] }
   0xf   :  { %871 = vmatpush3.msra.mxu0 %v120_v33  ;;  %v143_v49 = vsel %vm86_vm4, %v134_v23, 0.0  ;;  %890 = vmatprep.subr.mxu1 %v805_v1  ;;  %v798_v22 = vld [vmem:[%s1276_s1 + $0x80] sm:$0xff]  ;;  %v797_v23 = vld [vmem:[%s1276_s1 + $0x78] sm:$0xff] }
  0x10   :  { %872 = vmatprep.subr.mxu0 %v119_v35  ;;  %vm88_vm8 = vcmp.ge.s32.totalorder %v1111_v48, 0  ;;  %891 = vmatpush3.msra.mxu1 %v805_v1  ;;  %v794_v27 = vld [vmem:[%s1276_s1 + $0x60] sm:$0xff]  ;;  %v555_v48 = vld [vmem:[%s1278_s3 + $0x50] sm:$0xff] }
  0x11   :  { %194 = vrot.lane.b32.xlu1 %v167_v36, %s979_s7  ;;  %873 = vmatpush3.msra.mxu0 %v119_v35  ;;  %v145_v54 = vsel %vm88_vm8, %v132_v30, 0.0 }
  0x12   :  { %874 = vmatprep.subr.mxu0 %v118_v37  ;;  %892 = vmatprep.subr.mxu1 %v804_v2 }
  0x13   :  { %875 = vmatpush3.msra.mxu0 %v118_v37  ;;  %893 = vmatpush3.msra.mxu1 %v804_v2 }
  0x14   :  { %876 = vmatprep.subr.mxu0 %v117_v38  ;;  %894 = vmatprep.subr.mxu1 %v803_v3 }
  0x15   :  { %877 = vmatpush3.msra.mxu0 %v117_v38  ;;  %895 = vmatpush3.msra.mxu1 %v803_v3 }
  0x16   :  { %878 = vmatprep.subr.mxu0 %v116_v39  ;;  %896 = vmatprep.subr.mxu1 %v802_v4 }
  0x17   :  { %879 = vmatpush3.msra.mxu0 %v116_v39  ;;  %897 = vmatpush3.msra.mxu1 %v802_v4 }
  0x18   :  { %880 = vmatprep.subr.mxu0 %v115_v40  ;;  %898 = vmatprep.subr.mxu1 %v801_v5 }
  0x19   :  { %881 = vmatpush3.msra.mxu0 %v115_v40  ;;  %899 = vmatpush3.msra.mxu1 %v801_v5 }
  0x1a   :  { %882 = vmatprep.subr.mxu0 %v114_v41  ;;  %900 = vmatprep.subr.mxu1 %v800_v6 }
  0x1b   :  { %883 = vmatpush3.msra.mxu0 %v114_v41  ;;  %901 = vmatpush3.msra.mxu1 %v800_v6 }
  0x1c   :  { %902 = vmatprep.subr.mxu1 %v799_v7  ;;  %611 = vmatprep.subr.mxu0 %v555_v48 }
  0x1d   :  { %903 = vmatpush3.msra.mxu1 %v799_v7 }
  0x1e   :  { %904 = vmatprep.subr.mxu1 %v798_v22 }
  0x1f   :  { %905 = vmatpush3.msra.mxu1 %v798_v22  ;;  %v549_v22 = vld [vmem:[%s1278_s3 + $0x20] sm:$0xff] }
  0x20   :  { %906 = vmatprep.subr.mxu1 %v797_v23 }
  0x21   :  { %907 = vmatpush3.msra.mxu1 %v797_v23  ;;  %v548_v23 = vld [vmem:[%s1278_s3 + $0x18] sm:$0xff] }
  0x74   :  { %v173_v46 = vpop.permute.xlu0 %172  ;;  %v179_v47 = vpop.permute.xlu1 %178 }
  0x75   :  { %v201_v51 = vsel %vm200_vm5, %v143_v49, %v173_v46  ;;  %v204_v62 = vsel %vm200_vm5, %v1054_v24, %v179_v47  ;;  %v796_v24 = vld [vmem:[%s1276_s1 + $0x70] sm:$0xff] }
  0x76   :  { %908 = vmatprep.subr.mxu1 %v796_v24 }
  0x77   :  { %909 = vmatpush3.msra.mxu1 %v796_v24  ;;  %v550_v24 = vld [vmem:[%s1278_s3 + $0x28] sm:$0xff] }
  0x78   :  { %v175_v50 = vpop.permute.xlu0 %174  ;;  %v189_v52 = vpop.permute.xlu1 %188 }
  0x79   :  { %v206_v53 = vsel %vm205_vm6, %v201_v51, %v189_v52  ;;  %v202_v57 = vsel %vm200_vm5, %v1058_v25, %v175_v50  ;;  %v795_v25 = vld [vmem:[%s1276_s1 + $0x68] sm:$0xff] }
  0x7a   :  { %884 = vmatprep.mubr.msk.f32.mxu0 %vm217_vm7, %v206_v53  ;;  %910 = vmatprep.subr.mxu1 %v795_v25 }
  0x7b   :  { %911 = vmatpush3.msra.mxu1 %v795_v25  ;;  %v546_v25 = vld [vmem:[%s1278_s3 + $0x8] sm:$0xff] }
  0x7c   :  { %v177_v55 = vpop.permute.xlu0 %176  ;;  %912 = vmatprep.subr.mxu1 %v794_v27 }
  0x7d   :  { %v203_v56 = vsel %vm200_vm5, %v145_v54, %v177_v55  ;;  %913 = vmatpush3.msra.mxu1 %v794_v27  ;;  %v545_v27 = vld [vmem:[%s1278_s3] sm:$0xff] }
  0x7f   :  { %v191_v58 = vpop.permute.xlu1 %190 }
  0x80   :  { %v207_v59 = vsel %vm205_vm6, %v202_v57, %v191_v58  ;;  %v193_v60 = vpop.permute.xlu0 %192 }
  0x81   :  { %v208_v61 = vsel %vm205_vm6, %v203_v56, %v193_v60  ;;  %885 = vmatmul.mubr.msk.f32.vlgmr.msra.gmra.mxu0 %vm217_vm7, %v207_v59 }
  0x82   :  { %887 = vmatprep.mubr.msk.f32.mxu0 %vm217_vm7, %v208_v61 }
  0x83   :  { %v195_v63 = vpop.permute.xlu1 %194 }
  0x84   :  { %v209_v0 = vsel %vm205_vm6, %v204_v62, %v195_v63 }
  0x85   :  { %888 = vmatmul.mubr.msk.f32.gmra.mxu0 %vm217_vm7, %v209_v0 }
 0x141   :  { %v886_v10 = vpop.f32.mrf.mxu0 }
 0x142   :  { %v302_v11 = vadd.f32 %v886_v10, %v789_v9 }
 0x143   :  { %v296_v12 = vpop.f32.mrf.mxu0 }
 0x144   :  { %v320_v13 = vmul.f32 0.70710677, %v302_v11  ;;  %v297_v14 = vadd.f32 %v789_v9, %v296_v12  ;;  %v316_v30 = vmul.f32 0.5, %v302_v11 }
 0x145   :  { %v889_v15 = vpop.f32.mrf.mxu0 }
 0x146   :  { %940 = verf.f32 %v320_v13  ;;  %v319_v16 = vmul.f32 0.70710677, %v297_v14  ;;  %v312_v17 = vadd.f32 %v889_v15, %v789_v9  ;;  %v315_v33 = vmul.f32 0.5, %v297_v14 }
 0x147   :  { %v306_v18 = vpop.f32.mrf.mxu0 }
 0x148   :  { %942 = verf.f32 %v319_v16  ;;  %v322_v19 = vmul.f32 0.70710677, %v312_v17  ;;  %v307_v20 = vadd.f32 %v789_v9, %v306_v18  ;;  %v318_v37 = vmul.f32 0.5, %v312_v17  ;;  %v554_v17 = vld [vmem:[%s1278_s3 + $0x48] sm:$0xff]  ;;  %v556_v18 = vld [vmem:[%s1278_s3 + $0x58] sm:$0xff] }
 0x149   :  { %612 = vmatpush1.msra.mxu0 %v554_v17  ;;  %920 = vmatprep.subr.mxu1 %v556_v18 }
 0x14a   :  { %944 = verf.f32 %v322_v19  ;;  %v321_v21 = vmul.f32 0.70710677, %v307_v20  ;;  %v317_v41 = vmul.f32 0.5, %v307_v20  ;;  %v552_v19 = vld [vmem:[%s1278_s3 + $0x38] sm:$0xff]  ;;  %v551_v20 = vld [vmem:[%s1278_s3 + $0x30] sm:$0xff] }
 0x14b   :  { %613 = vmatprep.subr.mxu0 %v552_v19 }
 0x14c   :  { %946 = verf.f32 %v321_v21  ;;  %v553_v21 = vld [vmem:[%s1278_s3 + $0x40] sm:$0xff]  ;;  %614 = vmatpush1.msra.mxu0 %v551_v20 }
 0x14d   :  { %615 = vmatprep.subr.mxu0 %v549_v22 }
 0x14e   :  { %616 = vmatpush1.msra.mxu0 %v548_v23 }
 0x14f   :  { %617 = vmatprep.subr.mxu0 %v546_v25 }
 0x150   :  { %618 = vmatpush1.msra.mxu0 %v545_v27 }
 0x153   :  { %v941_v29 = vpop.eup %940 }
 0x154   :  { %v328_v31 = vadd.f32 1.0, %v941_v29  ;;  %v547_v29 = vld [vmem:[%s1278_s3 + $0x10] sm:$0xff] }
 0x155   :  { %v943_v32 = vpop.eup %942 }
 0x156   :  { %v332_v34 = vmul.f32 %v328_v31, %v316_v30  ;;  %v327_v35 = vadd.f32 1.0, %v943_v32  ;;  %v980_v30 = vmov 0.0   ;;  %v807_v31 = vld [vmem:[%s1277_s2 + $0x1] ss:$0 sm:$0xff] }
 0x157   :  { %v945_v36 = vpop.eup %944  ;;  %651 = vmatprep.mubr.f32.mxu0 %v980_v30 }
 0x158   :  { %378 = vrot.lane.b32.xlu1 %v332_v34, %s978_s24  ;;  %v331_v38 = vmul.f32 %v327_v35, %v315_v33  ;;  %v330_v39 = vadd.f32 1.0, %v945_v36  ;;  %v361_v42 = vrot.slane %v332_v34, 1  ;;  %v349_v49 = vrot.slane %v332_v34, 7 }
 0x159   :  { %v947_v40 = vpop.eup %946 }
 0x15a   :  { %v329_v43 = vadd.f32 1.0, %v947_v40  ;;  %376 = vrot.lane.b32.xlu0 %v331_v38, %s978_s24  ;;  %v360_v45 = vrot.slane %v331_v38, 1  ;;  %v334_v46 = vmul.f32 %v330_v39, %v318_v37  ;;  %v348_v47 = vrot.slane %v331_v38, 7 }
 0x15c   :  { %v333_v50 = vmul.f32 %v329_v43, %v317_v41  ;;  %v366_v51 = vsel %vm151_vm0, %v360_v45, %v361_v42  ;;  %v351_v52 = vrot.slane %v334_v46, 7  ;;  %v354_v53 = vsel %vm130_vm1, %v348_v47, %v349_v49 }
 0x15d   :  { %v363_v61 = vrot.slane %v334_v46, 1 }
 0x15e   :  { %v350_v54 = vrot.slane %v333_v50, 7  ;;  %392 = vrot.lane.b32.xlu0 %v366_v51, %s979_s7  ;;  %v362_v55 = vrot.slane %v333_v50, 1  ;;  %v355_v56 = vsel %vm130_vm1, %v351_v52, %v348_v47 }
 0x15f   :  { %v367_v63 = vsel %vm151_vm0, %v363_v61, %v360_v45  ;;  %v356_v1 = vsel %vm86_vm4, %v355_v56, 0.0 }
 0x160   :  { %v365_v57 = vsel %vm151_vm0, %v361_v42, %v362_v55  ;;  %v353_v58 = vsel %vm130_vm1, %v349_v49, %v350_v54  ;;  %v352_v59 = vsel %vm130_vm1, %v350_v54, %v351_v52  ;;  %v364_v62 = vsel %vm151_vm0, %v362_v55, %v363_v61 }
 0x161   :  { %v369_v60 = vsel %vm107_vm2, %v365_v57, 0.0  ;;  %v371_v0 = vsel %vm109_vm3, %v367_v63, 0.0  ;;  %v358_v44 = vsel %vm88_vm8, %v353_v58, 0.0 }
 0x162   :  { %394 = vrot.lane.b32.xlu1 %v369_v60, %s979_s7  ;;  %380 = vrot.lane.b32.xlu0 %v333_v50, %s978_s24 }
 0x166   :  { %382 = vrot.lane.b32.xlu1 %v334_v46, %s978_s24  ;;  %396 = vrot.lane.b32.xlu0 %v364_v62, %s979_s7 }
 0x16a   :  { %398 = vrot.lane.b32.xlu1 %v371_v0, %s979_s7 }
 0x1ca   :  { %v379_v2 = vpop.permute.xlu1 %378 }
 0x1cb   :  { %v405_v6 = vsel %vm200_vm5, %v354_v53, %v379_v2  ;;  %v557_v2 = vld [vmem:[%s1279_s4] sm:$0x7]  ;;  %s981_s4 = smov [#allocation3]  }
 0x1cc   :  { %v377_v26 = vpop.permute.xlu0 %376  ;;  %s778_s28 = sshll.u32 %s981_s4, 4  ;;  %s779_s28 = int_to_ptr.vmem [resolvable:$true] %s778_s28 }
 0x1cd   :  { %v404_v3 = vsel %vm200_vm5, %v356_v1, %v377_v26  ;;  %v561_v1 = vsub.s32 0, %v1031_v8  ;;  %s956_s1 = scalar_lea.vmem %s779_s28, 1536  ;;  %p961_p1 = scmp.lt.s32.totalorder %s779_s28, %s779_s28 }
 0x1ce   :  { %p957_p0 = scmp.ne.s32.totalorder %s779_s28, %s956_s1  ;;  %p962_p2 = scmp.lt.s32.totalorder %s956_s1, %s956_s1 }
 0x1d0   :  { %v393_v4 = vpop.permute.xlu0 %392  ;;  %p963_p3 = por %p962_p2, %p961_p1 }
 0x1d1   :  { %v408_v5 = vsel %vm205_vm6, %v404_v3, %v393_v4  ;;  %v569_v3 = vsub.s32 2, %v1031_v8  ;;  %v565_v4 = vsub.s32 1, %v1031_v8 }
 0x1d2   :  { %914 = vmatprep.mubr.msk.f32.mxu1 %vm217_vm7, %v408_v5  ;;  %v562_v5 = vrot.slane %v557_v2, %v561_v1  ;;  %p964_p4 = pnand %p963_p3, %p957_p0 }
 0x1d4   :  { %v395_v7 = vpop.permute.xlu1 %394  ;;  %v381_v9 = vpop.permute.xlu0 %380 }
 0x1d5   :  { %v409_v28 = vsel %vm205_vm6, %v405_v6, %v395_v7  ;;  %v406_v10 = vsel %vm200_vm5, %v358_v44, %v381_v9  ;;  %v570_v6 = vrot.slane %v557_v2, %v569_v3  ;;  %v566_v7 = vrot.slane %v557_v2, %v565_v4 }
 0x1d6   :  { %915 = vmatmul.mubr.msk.f32.vlgmr.msra.gmra.mxu1 %vm217_vm7, %v409_v28 }
 0x1d7   :  { %921 = vmatpush3.msra.mxu1 %v556_v18 }
 0x1d8   :  { %v383_v11 = vpop.permute.xlu1 %382  ;;  %v397_v12 = vpop.permute.xlu0 %396  ;;  %922 = vmatprep.subr.mxu1 %v553_v21 }
 0x1d9   :  { %v410_v13 = vsel %vm205_vm6, %v406_v10, %v397_v12  ;;  %v407_v14 = vsel %vm200_vm5, %v352_v59, %v383_v11  ;;  %923 = vmatpush3.msra.mxu1 %v553_v21 }
 0x1da   :  { %917 = vmatprep.mubr.msk.f32.mxu1 %vm217_vm7, %v410_v13  ;;  %924 = vmatprep.subr.mxu1 %v550_v24 }
 0x1db   :  { %925 = vmatpush3.msra.mxu1 %v550_v24 }
 0x1dc   :  { %v399_v15 = vpop.permute.xlu1 %398  ;;  %926 = vmatprep.subr.mxu1 %v547_v29 }
 0x1dd   :  { %v411_v16 = vsel %vm205_vm6, %v407_v14, %v399_v15  ;;  %927 = vmatpush3.msra.mxu1 %v547_v29 }
 0x1de   :  { %918 = vmatmul.mubr.msk.f32.gmra.mxu1 %vm217_vm7, %v411_v16 }
 0x296   :  { %v916_v32 = vpop.f32.mrf.mxu1 }
 0x297   :  { %v504_v33 = vadd.f32 %v916_v32, %v807_v31 }
 0x298   :  { %v498_v34 = vpop.f32.mrf.mxu1 }
 0x299   :  { %v522_v35 = vmul.f32 0.70710677, %v504_v33  ;;  %v499_v36 = vadd.f32 %v807_v31, %v498_v34  ;;  %v518_v46 = vmul.f32 0.5, %v504_v33 }
 0x29b   :  { %948 = verf.f32 %v522_v35  ;;  %v521_v37 = vmul.f32 0.70710677, %v499_v36  ;;  %v517_v51 = vmul.f32 0.5, %v499_v36 }
 0x29d   :  { %950 = verf.f32 %v521_v37 }
 0x29e   :  { %v919_v38 = vpop.f32.mrf.mxu1 }
 0x29f   :  { %v514_v39 = vadd.f32 %v919_v38, %v807_v31 }
 0x2a0   :  { %v508_v40 = vpop.f32.mrf.mxu1 }
 0x2a1   :  { %v524_v41 = vmul.f32 0.70710677, %v514_v39  ;;  %v509_v42 = vadd.f32 %v807_v31, %v508_v40  ;;  %v520_v55 = vmul.f32 0.5, %v514_v39 }
 0x2a3   :  { %952 = verf.f32 %v524_v41  ;;  %v523_v43 = vmul.f32 0.70710677, %v509_v42  ;;  %v519_v59 = vmul.f32 0.5, %v509_v42 }
 0x2a5   :  { %954 = verf.f32 %v523_v43 }
 0x2a8   :  { %v949_v45 = vpop.eup %948 }
 0x2a9   :  { %v530_v47 = vadd.f32 1.0, %v949_v45 }
 0x2aa   :  { %v951_v49 = vpop.eup %950 }
 0x2ab   :  { %v534_v50 = vmul.f32 %v530_v47, %v518_v46  ;;  %v529_v52 = vadd.f32 1.0, %v951_v49 }
 0x2ad   :  { %538 = vst.msk [vmem:[#allocation2 + $0x8] sm:$0xff] %vm200_vm5, %v534_v50  ;;  %v533_v53 = vmul.f32 %v529_v52, %v517_v51 }
 0x2af   :  { %537 = vst.msk [vmem:[#allocation2] sm:$0xff] %vm200_vm5, %v533_v53 }
 0x2b0   :  { %v953_v54 = vpop.eup %952 }
 0x2b1   :  { %v532_v56 = vadd.f32 1.0, %v953_v54 }
 0x2b2   :  { %v955_v57 = vpop.eup %954 }
 0x2b3   :  { %v536_v58 = vmul.f32 %v532_v56, %v520_v55  ;;  %v531_v60 = vadd.f32 1.0, %v955_v57 }
 0x2b4   :  { %v542_v63 = vld [vmem:[#allocation2 + $0x8] sm:$0xff] }
 0x2b5   :  { %540 = vst.msk [vmem:[#allocation2 + $0x18] sm:$0xff] %vm200_vm5, %v536_v58  ;;  %v535_v61 = vmul.f32 %v531_v60, %v519_v59 }
 0x2b6   :  { %v541_v62 = vld [vmem:[#allocation2] sm:$0xff] }
 0x2b7   :  { %539 = vst.msk [vmem:[#allocation2 + $0x10] sm:$0xff] %vm200_vm5, %v535_v61  ;;  %812 = vmatmul.mubr.msk.f32.vlgmr.msra.gmra.mxu0 %vm200_vm5, %v541_v62  ;;  %928 = vmatprep.mubr.msk.f32.mxu1 %vm200_vm5, %v541_v62 }
 0x2b8   :  { %929 = vmatmul.mubr.msk.f32.vlgmr.msra.gmra.mxu1 %vm200_vm5, %v542_v63  ;;  %657 = vmatprep.mubr.f32.mxu0 %v980_v30 }
 0x2bb   :  { %813 = vmatmul.mubr.msk.f32.gmra.mxu0 %vm200_vm5, %v542_v63 }
 0x2bc   :  { %663 = vmatprep.mubr.f32.mxu0 %v980_v30  ;;  %v544_v26 = vld [vmem:[#allocation2 + $0x18] sm:$0xff] }
 0x2be   :  { %v543_v0 = vld [vmem:[#allocation2 + $0x10] sm:$0xff] }
 0x2bf   :  { %814 = vmatmul.mubr.msk.f32.gmra.mxu0 %vm200_vm5, %v543_v0  ;;  %931 = vmatprep.mubr.msk.f32.mxu1 %vm200_vm5, %v543_v0 }
 0x2c0   :  { %932 = vmatmul.mubr.msk.f32.gmra.mxu1 %vm200_vm5, %v544_v26  ;;  %669 = vmatprep.mubr.f32.mxu0 %v980_v30 }
 0x2c3   :  { %815 = vmatmul.mubr.msk.f32.gmra.mxu0 %vm200_vm5, %v544_v26 }
 0x377   :  { %v653_v9 = vpop.f32.mrf.mxu0 }
 0x378   :  { %v654_v28 = vadd.f32 %v653_v9, %v562_v5  ;;  %v930_v44 = vpop.f32.mrf.mxu1 }
 0x379   :  { %v748_v10 = vadd.f32 %v930_v44, %v570_v6  ;;  %v655_v11 = vpop.f32.mrf.mxu0 }
 0x37a   :  { %761 = vst [vmem:[#allocation3] sm:$0xff] %v654_v28  ;;  %v656_v12 = vadd.f32 %v655_v11, %v566_v7  ;;  %v742_v13 = vpop.f32.mrf.mxu1 }
 0x37b   :  { %766 = vst [vmem:[#allocation3 + $0x28] sm:$0xff] %v748_v10  ;;  %v743_v14 = vadd.f32 %v742_v13, %v570_v6  ;;  %v659_v15 = vpop.f32.mrf.mxu0 }
 0x37c   :  { %762 = vst [vmem:[#allocation3 + $0x8] sm:$0xff] %v656_v12  ;;  %v660_v16 = vadd.f32 %v659_v15, %v562_v5 }
 0x37d   :  { %763 = vst [vmem:[#allocation3 + $0x10] sm:$0xff] %v743_v14  ;;  %v661_v48 = vpop.f32.mrf.mxu0 }
 0x37e   :  { %764 = vst [vmem:[#allocation3 + $0x18] sm:$0xff] %v660_v16  ;;  %v662_v8 = vadd.f32 %v661_v48, %v566_v7 }
 0x37f   :  { %v665_v17 = vpop.f32.mrf.mxu0 }
 0x380   :  { %765 = vst [vmem:[#allocation3 + $0x20] sm:$0xff] %v662_v8  ;;  %v666_v18 = vadd.f32 %v665_v17, %v562_v5  ;;  %v933_v19 = vpop.f32.mrf.mxu1 }
 0x381   :  { %v758_v20 = vadd.f32 %v933_v19, %v570_v6  ;;  %v667_v21 = vpop.f32.mrf.mxu0 }
 0x382   :  { %767 = vst [vmem:[#allocation3 + $0x30] sm:$0xff] %v666_v18  ;;  %v668_v22 = vadd.f32 %v667_v21, %v566_v7  ;;  %v752_v23 = vpop.f32.mrf.mxu1 }
 0x383   :  { %772 = vst [vmem:[#allocation3 + $0x58] sm:$0xff] %v758_v20  ;;  %v753_v24 = vadd.f32 %v752_v23, %v570_v6  ;;  %v671_v25 = vpop.f32.mrf.mxu0 }
 0x384   :  { %768 = vst [vmem:[#allocation3 + $0x38] sm:$0xff] %v668_v22  ;;  %v672_v27 = vadd.f32 %v671_v25, %v562_v5 }
 0x385   :  { %769 = vst [vmem:[#allocation3 + $0x40] sm:$0xff] %v753_v24  ;;  %v673_v29 = vpop.f32.mrf.mxu0 }
 0x386   :  { %770 = vst [vmem:[#allocation3 + $0x48] sm:$0xff] %v672_v27  ;;  %v674_v30 = vadd.f32 %v673_v29, %v566_v7 }
 0x388   :  { %771 = vst [vmem:[#allocation3 + $0x50] sm:$0xff] %v674_v30 }
 0x389   :  { %967 = shalt.err (!%p964_p4)
}
 0x38a   :  { %s982_s24 = smov 384   ;;  %s983_s7 = smov 24  }
 0x38b   :  { %784 = dma.vmem_to_hbm [thread:$0]  %s779_s28, 1536, %s1280_s5, [#allocation4], %s982_s24, %s982_s24, %s983_s7  }
 0x38c   :  { %976 = dma.done.wait [#allocation4], 1536  }
 0x38d   :  { %977 = vsyncadd [#allocation4], 4294965760 }
 0x38e   :  { %788 = vsyncpa [#allocation4], 1 }

</bundles_post_ra>
